<compile_context>
chip_gen: v5e
topology: v5e:2x2
jax: 0.10.0
libtpu: 0.0.40
codegen_flags: <defaults>
</compile_context>

<pallas_src>
import functools

import numpy as np
import jax
import jax.numpy as jnp
from jax import lax
from jax.experimental import pallas as pl
from jax.experimental.pallas import tpu as pltpu

LANE = 128


def _round_up(x, m):
    return ((x + m - 1) // m) * m


def _tpu_vmem_capacity_bytes():
    try:
        return int(pltpu.get_tpu_info().vmem_capacity_bytes)
    except Exception:
        return 64 * 1024 * 1024  # conservative (v7x-sized) fallback


# --------------------------------------------------------------------------
# Kernel 1: node projection   z = h @ Wn ,  s_dst = z @ wa3
# --------------------------------------------------------------------------
def node_proj_kernel(h_ref, wn_ref, wa3_ref, z_ref, sdst_ref):
    f32 = jnp.float32
    z = jnp.dot(h_ref[...], wn_ref[...], preferred_element_type=f32)        # [TN, OP]
    z_ref[...] = z
    sdst_ref[...] = jnp.dot(z, wa3_ref[...], preferred_element_type=f32)    # [TN, 1]


# --------------------------------------------------------------------------
# Kernel 2: edge projection
#   zne  = [ z[src] | ef @ We ]                       (stored bf16)
#   elog = leaky_relu(zne @ [wa1;wa2] + s_dst[dst])   (full per-edge logit)
# --------------------------------------------------------------------------
def edge_proj_kernel(ef_ref, zsrc_ref, sdst_ref, we_ref, wa_ref, zne_ref, elog_ref):
    f32 = jnp.float32
    eft = jnp.dot(ef_ref[...], we_ref[...], preferred_element_type=f32)     # [TE, FP]
    zne = jnp.concatenate([zsrc_ref[...], eft], axis=1)                     # [TE, C]
    zne_ref[...] = zne.astype(zne_ref.dtype)                                # bf16 store
    a = jnp.dot(zne, wa_ref[...], preferred_element_type=f32) + sdst_ref[...]
    elog_ref[...] = jnp.where(a >= 0.0, a, 0.01 * a)                        # leaky_relu


# --------------------------------------------------------------------------
# Kernel 3: per-destination masked online-softmax aggregation + fc2
# grid = (node_blocks [parallel], edge_blocks [arbitrary, innermost reduction])
# scalar prefetch: per-node-block edge-tile range [lo, hi) for tile skipping.
# --------------------------------------------------------------------------
def _edge_tile_index(j, lo, hi):
    # Clamp j into [lo, max(hi-1, lo)]: outside the active range the block
    # index repeats, so Pallas elides the DMA for those grid steps.
    last = jnp.maximum(hi - 1, lo)
    return jnp.maximum(jnp.minimum(j, last), lo)


def gat_agg_kernel(lo_ref, hi_ref, zne_ref, elog_ref, dst_ref, z_ref, w2_ref,
                   out_ref, m_sc, l_sc, acc_sc, *, tn):
    f32 = jnp.float32
    i = pl.program_id(0)
    j = pl.program_id(1)

    @pl.when(j == 0)
    def _init():
        m_sc[...] = jnp.full(m_sc.shape, -1e30, f32)
        l_sc[...] = jnp.zeros(l_sc.shape, f32)
        acc_sc[...] = jnp.zeros(acc_sc.shape, f32)

    lo = lo_ref[i]
    hi = hi_ref[i]

    @pl.when(jnp.logical_and(j >= lo, j < hi))
    def _accumulate():
        zne = zne_ref[...]                                       # [TE, C] bf16
        # dst mask from a column iota (cheap broadcast compare, no [TN,TE] iota)
        row_ids = i * tn + lax.broadcasted_iota(jnp.int32, (tn, 1), 0)
        mask = dst_ref[...] == row_ids                           # [TN, TE]
        scores = jnp.where(mask, elog_ref[...], -1e30)           # [TN, TE]
        m_prev = m_sc[...]
        m_new = jnp.maximum(m_prev, jnp.max(scores, axis=1, keepdims=True))
        corr = jnp.exp(m_prev - m_new)
        # keep the mask select: all-masked rows must contribute exactly zero
        p = jnp.where(mask, jnp.exp(scores - m_new), 0.0)        # [TN, TE]
        l_sc[...] = corr * l_sc[...] + jnp.sum(p, axis=1, keepdims=True)
        acc_sc[...] = corr * acc_sc[...] + jnp.dot(
            p.astype(zne.dtype), zne, preferred_element_type=f32)
        m_sc[...] = m_new

    @pl.when(j == pl.num_programs(1) - 1)
    def _finalize():
        l = l_sc[...]
        has_in = l > 0.0
        l_safe = jnp.where(has_in, l, 1.0)
        inv = pl.reciprocal(l_safe, approx=True)                 # EUP slot
        inv = inv * (2.0 - l_safe * inv)                         # Newton -> ~f32 accuracy
        h_agg = acc_sc[...] * inv                                # [TN, C]
        h_out = jnp.dot(h_agg, w2_ref[...], preferred_element_type=f32)  # [TN, OP]
        # DGL semantics: zero in-degree nodes keep z = fc_n(h)
        out_ref[...] = jnp.where(has_in, h_out, z_ref[...])


# --------------------------------------------------------------------------
# Wrapper
# --------------------------------------------------------------------------
@jax.jit
def gat_layer_forward(node_feats, edge_feats, src_idx, dst_idx, wn, we, wa, w2):
    f32 = jnp.float32
    bf16 = jnp.bfloat16
    N, node_dim = node_feats.shape
    E, edge_dim = edge_feats.shape
    out_dim = wn.shape[1]
    eft_dim = we.shape[1]

    OP = _round_up(out_dim, LANE)
    FP = _round_up(eft_dim, LANE)
    DP = _round_up(node_dim, LANE)
    EDP = _round_up(edge_dim, LANE)
    C = OP + FP

    # ---- per-generation tiling / VMEM budget ------------------------------
    vmem_phys = _tpu_vmem_capacity_bytes()
    vmem_cap = int(min(max(vmem_phys // 2, 32 * 1024 * 1024), 100 * 1024 * 1024))
    # TE >= 256 fills the 256-wide MXU contraction on v6e/v7x; 512 on 128-MiB parts.
    TE_target = 512 if vmem_phys >= (100 << 20) else 256
    TN_target = 256

    TE = min(TE_target, _round_up(max(E, 1), LANE))
    E_pad = _round_up(max(E, 1), TE)
    nj = E_pad // TE

    if N <= 16:
        TN = _round_up(max(N, 1), 8)
    else:
        # keep >=2 node blocks when possible so the "parallel" axis can shard
        # across TensorCores (v7x has 2 TCs/chip)
        TN = min(TN_target, _round_up((N + 1) // 2, 8))
    N_pad = _round_up(N, TN)
    ni = N_pad // TN

    # ---- graph preprocessing: sort edges by dst, block-sparse tile ranges --
    src = src_idx.astype(jnp.int32)
    dst = dst_idx.astype(jnp.int32)
    order = jnp.argsort(dst)
    src_s = src[order]
    dst_s = dst[order]
    ef_s = edge_feats[order].astype(f32)

    block_bounds = jnp.arange(ni + 1, dtype=jnp.int32) * TN
    epos = jnp.searchsorted(dst_s, block_bounds, side="left").astype(jnp.int32)
    e_lo, e_hi = epos[:-1], epos[1:]
    lo_t = jnp.minimum(e_lo // TE, nj - 1).astype(jnp.int32)
    hi_t = jnp.where(e_hi > e_lo, (e_hi + TE - 1) // TE, lo_t)
    hi_t = jnp.minimum(hi_t, nj).astype(jnp.int32)

    # ---- zero-padded, lane-dense operands ----------------------------------
    h_p = jnp.zeros((N_pad, DP), f32).at[:N, :node_dim].set(node_feats.astype(f32))
    ef_p = jnp.zeros((E_pad, EDP), f32).at[:E, :edge_dim].set(ef_s)
    dst_row = jnp.full((1, E_pad), -1, jnp.int32).at[0, :E].set(dst_s)

    wn_p = jnp.zeros((DP, OP), f32).at[:node_dim, :out_dim].set(wn)
    we_p = jnp.zeros((EDP, FP), f32).at[:edge_dim, :eft_dim].set(we)
    wa1 = wa[:out_dim]
    wa2 = wa[out_dim:out_dim + eft_dim]
    wa3 = wa[out_dim + eft_dim:]
    wa_cat = (jnp.zeros((C, 1), f32)
              .at[:out_dim].set(wa1)
              .at[OP:OP + eft_dim].set(wa2))
    wa3_p = jnp.zeros((OP, 1), f32).at[:out_dim].set(wa3)
    w2_p = (jnp.zeros((C, OP), f32)
            .at[:out_dim, :out_dim].set(w2[:out_dim])
            .at[OP:OP + eft_dim, :out_dim].set(w2[out_dim:]))

    # ---- Kernel 1: node projection -----------------------------------------
    z, sdst = pl.pallas_call(
        node_proj_kernel,
        grid=(ni,),
        in_specs=[pl.BlockSpec((TN, DP), lambda i: (i, 0)),
                  pl.BlockSpec((DP, OP), lambda i: (0, 0)),
                  pl.BlockSpec((OP, 1), lambda i: (0, 0))],
        out_specs=[pl.BlockSpec((TN, OP), lambda i: (i, 0)),
                   pl.BlockSpec((TN, 1), lambda i: (i, 0))],
        out_shape=[jax.ShapeDtypeStruct((N_pad, OP), f32),
                   jax.ShapeDtypeStruct((N_pad, 1), f32)],
        compiler_params=pltpu.CompilerParams(
            dimension_semantics=("parallel",), vmem_limit_bytes=vmem_cap),
    )(h_p, wn_p, wa3_p)

    # ---- O(E) row / scalar gathers (XLA gather; no z residency in kernel 2) --
    z_src = jnp.take(z, src_s, axis=0)                       # [E, OP]
    sdst_e = jnp.take(sdst[:, 0], dst_s)                     # [E]
    zsrc_p = jnp.zeros((E_pad, OP), f32).at[:E].set(z_src)
    sdst_e_p = jnp.zeros((E_pad, 1), f32).at[:E, 0].set(sdst_e)

    # ---- Kernel 2: edge projection + full attention logit ------------------
    zne, elog = pl.pallas_call(
        edge_proj_kernel,
        grid=(nj,),
        in_specs=[pl.BlockSpec((TE, EDP), lambda j: (j, 0)),
                  pl.BlockSpec((TE, OP), lambda j: (j, 0)),
                  pl.BlockSpec((TE, 1), lambda j: (j, 0)),
                  pl.BlockSpec((EDP, FP), lambda j: (0, 0)),
                  pl.BlockSpec((C, 1), lambda j: (0, 0))],
        out_specs=[pl.BlockSpec((TE, C), lambda j: (j, 0)),
                   pl.BlockSpec((TE, 1), lambda j: (j, 0))],
        out_shape=[jax.ShapeDtypeStruct((E_pad, C), bf16),
                   jax.ShapeDtypeStruct((E_pad, 1), f32)],
        compiler_params=pltpu.CompilerParams(
            dimension_semantics=("parallel",), vmem_limit_bytes=vmem_cap),
    )(ef_p, zsrc_p, sdst_e_p, we_p, wa_cat)

    # layout plumbing only: present per-edge logits along the lane axis
    elog_row = jnp.reshape(elog, (1, E_pad))

    # ---- Kernel 3: block-sparse masked online-softmax aggregation + fc2 ----
    def _zne_map(i, j, lo, hi):
        return (_edge_tile_index(j, lo[i], hi[i]), 0)

    def _erow_map(i, j, lo, hi):
        return (0, _edge_tile_index(j, lo[i], hi[i]))

    out_p = pl.pallas_call(
        functools.partial(gat_agg_kernel, tn=TN),
        grid_spec=pltpu.PrefetchScalarGridSpec(
            num_scalar_prefetch=2,
            grid=(ni, nj),
            in_specs=[pl.BlockSpec((TE, C), _zne_map),
                      pl.BlockSpec((1, TE), _erow_map),
                      pl.BlockSpec((1, TE), _erow_map),
                      pl.BlockSpec((TN, OP), lambda i, j, lo, hi: (i, 0)),
                      pl.BlockSpec((C, OP), lambda i, j, lo, hi: (0, 0))],
            out_specs=pl.BlockSpec((TN, OP), lambda i, j, lo, hi: (i, 0)),
            scratch_shapes=[pltpu.VMEM((TN, 1), f32),      # running max
                            pltpu.VMEM((TN, 1), f32),      # running denom
                            pltpu.VMEM((TN, C), f32)]),    # running weighted sum
        out_shape=jax.ShapeDtypeStruct((N_pad, OP), f32),
        compiler_params=pltpu.CompilerParams(
            dimension_semantics=("parallel", "arbitrary"),
            vmem_limit_bytes=vmem_cap),
    )(lo_t, hi_t, zne, elog_row, dst_row, z, w2_p)

    return out_p[:N, :out_dim]


# --------------------------------------------------------------------------
# Reference + tests
# --------------------------------------------------------------------------
def init_linear(key, in_dim, out_dim):
    # mimics nn.Linear default init range U(-1/sqrt(in), 1/sqrt(in)); stored as [in, out]
    bound = 1.0 / np.sqrt(in_dim)
    return jax.random.uniform(key, (in_dim, out_dim), jnp.float32, -bound, bound)


def reference(node_feats, edge_feats, src, dst, wn, we, wa, w2):
    nf = np.asarray(node_feats, np.float64)
    ef = np.asarray(edge_feats, np.float64)
    wn = np.asarray(wn, np.float64); we = np.asarray(we, np.float64)
    wa = np.asarray(wa, np.float64); w2 = np.asarray(w2, np.float64)
    src = np.asarray(src); dst = np.asarray(dst)
    N = nf.shape[0]
    z = nf @ wn
    eft = ef @ we
    zne = np.concatenate([z[src], eft], axis=1)
    z2 = np.concatenate([zne, z[dst]], axis=1)
    a = (z2 @ wa)[:, 0]
    e = np.where(a >= 0.0, a, 0.01 * a)
    out = z.copy()                      # zero in-degree nodes keep fc_n(h)
    for n in range(N):
        idx = np.where(dst == n)[0]
        if idx.size == 0:
            continue
        ex = np.exp(e[idx] - e[idx].max())
        al = ex / ex.sum()
        h = (al[:, None] * zne[idx]).sum(0)
        out[n] = h @ w2
    return out


def _run_case(name, node_feats, edge_feats, src, dst, wn, we, wa, w2):
    out = gat_layer_forward(node_feats, edge_feats, jnp.asarray(src), jnp.asarray(dst),
                            wn, we, wa, w2)
    out = jax.block_until_ready(out)
    ref = reference(node_feats, edge_feats, src, dst, wn, we, wa, w2)
    # bf16 zne storage -> looser tolerance than a pure-f32 pipeline
    assert np.allclose(np.asarray(out, np.float64), ref, rtol=2e-2, atol=2e-2), \
        f"kernel output does not match reference ({name})"


if __name__ == "__main__":
    key = jax.random.PRNGKey(0)

    # ---- test 1: small deterministic graph (every node has in-degree 2) ----
    N, E = 8, 16
    node_dim, edge_dim, edge_ft_out_dim, out_dim = 32, 16, 8, 16
    ks = jax.random.split(key, 6)
    node_feats = jax.random.normal(ks[0], (N, node_dim), jnp.float32)
    edge_feats = jax.random.normal(ks[1], (E, edge_dim), jnp.float32)
    src = np.array(list(range(N)) + list(range(N)), dtype=np.int32)
    dst = np.array([(i + 1) % N for i in range(N)] + [(i + 2) % N for i in range(N)],
                   dtype=np.int32)
    wn = init_linear(ks[2], node_dim, out_dim)
    we = init_linear(ks[3], edge_dim, edge_ft_out_dim)
    wa = init_linear(ks[4], out_dim + edge_ft_out_dim + out_dim, 1)
    w2 = init_linear(ks[5], out_dim + edge_ft_out_dim, out_dim)
    _run_case("small", node_feats, edge_feats, src, dst, wn, we, wa, w2)

    # ---- test 2: larger random graph -> multi-tile online softmax, node
    #      blocking, block-sparse tile skipping, zero in-degree fallback ------
    N2, E2 = 200, 2000
    nd2, ed2, eo2, od2 = 48, 24, 12, 20
    ks2 = jax.random.split(jax.random.PRNGKey(0), 8)
    node_feats2 = jax.random.normal(ks2[0], (N2, nd2), jnp.float32)
    edge_feats2 = jax.random.normal(ks2[1], (E2, ed2), jnp.float32)
    src2 = np.asarray(jax.random.randint(ks2[2], (E2,), 0, N2, jnp.int32))
    # restrict dst so the last 4 nodes have zero in-degree (DGL keeps fc_n(h))
    dst2 = np.asarray(jax.random.randint(ks2[3], (E2,), 0, N2 - 4, jnp.int32))
    wn2 = init_linear(ks2[4], nd2, od2)
    we2 = init_linear(ks2[5], ed2, eo2)
    wa2 = init_linear(ks2[6], od2 + eo2 + od2, 1)
    w22 = init_linear(ks2[7], od2 + eo2, od2)
    _run_case("large", node_feats2, edge_feats2, src2, dst2, wn2, we2, wa2, w22)

    print("KERNEL_OK")
</pallas_src>

<mosaic_0001>
module attributes {stable_mosaic.version = 11 : i64} {
  func.func @node_proj_kernel(%arg0: i32, %arg1: memref<8x128xf32, #tpu.memory_space<vmem>>, %arg2: memref<128x128xf32, #tpu.memory_space<vmem>>, %arg3: memref<128x1xf32, #tpu.memory_space<vmem>>, %arg4: memref<8x128xf32, #tpu.memory_space<vmem>>, %arg5: memref<8x1xf32, #tpu.memory_space<vmem>>) attributes {dimension_semantics = [#tpu.dimension_semantics<parallel>], iteration_bounds = array<i64: 1>, scalar_prefetch = 0 : i64, scratch_operands = 0 : i64, tpu.core_type = #tpu.core_type<tc>, window_params = [{transform_indices = @transform_0, window_bounds = array<i64: 8, 128>}, {pipeline_mode = #tpu.pipeline_mode<synchronous>, transform_indices = @transform_1, window_bounds = array<i64: 128, 128>}, {pipeline_mode = #tpu.pipeline_mode<synchronous>, transform_indices = @transform_2, window_bounds = array<i64: 128, 1>}, {transform_indices = @transform_3, window_bounds = array<i64: 8, 128>}, {transform_indices = @transform_4, window_bounds = array<i64: 8, 1>}]} {
    %c0 = arith.constant 0 : index
    %c0_0 = arith.constant 0 : index
    %0 = vector.load %arg1[%c0, %c0_0] : memref<8x128xf32, #tpu.memory_space<vmem>>, vector<8x128xf32>
    %c0_1 = arith.constant 0 : index
    %c0_2 = arith.constant 0 : index
    %1 = vector.load %arg2[%c0_1, %c0_2] : memref<128x128xf32, #tpu.memory_space<vmem>>, vector<128x128xf32>
    %cst = arith.constant dense<0.000000e+00> : vector<8x128xf32>
    %2 = tpu.matmul %0, %1, %cst {dimension_numbers = #tpu.dot_dimension_numbers<[1], [0], [0], [1], [0, 0, 1, 1], [], []>} : vector<8x128xf32>, vector<128x128xf32>, vector<8x128xf32> -> vector<8x128xf32>
    %c0_3 = arith.constant 0 : index
    %c0_4 = arith.constant 0 : index
    %3 = vector.load %arg4[%c0_3, %c0_4] : memref<8x128xf32, #tpu.memory_space<vmem>>, vector<8x128xf32>
    tpu.vector_store %arg4[%c0_3, %c0_4], %2 {strides = array<i32>} : memref<8x128xf32, #tpu.memory_space<vmem>>, vector<8x128xf32>,
    %c0_5 = arith.constant 0 : index
    %c0_6 = arith.constant 0 : index
    %4 = vector.load %arg3[%c0_5, %c0_6] : memref<128x1xf32, #tpu.memory_space<vmem>>, vector<128x1xf32>
    %cst_7 = arith.constant dense<0.000000e+00> : vector<8x1xf32>
    %5 = tpu.matmul %2, %4, %cst_7 {dimension_numbers = #tpu.dot_dimension_numbers<[1], [0], [0], [1], [0, 0, 1, 1], [], []>} : vector<8x128xf32>, vector<128x1xf32>, vector<8x1xf32> -> vector<8x1xf32>
    %c0_8 = arith.constant 0 : index
    %c0_9 = arith.constant 0 : index
    %6 = vector.load %arg5[%c0_8, %c0_9] : memref<8x1xf32, #tpu.memory_space<vmem>>, vector<8x1xf32>
    tpu.vector_store %arg5[%c0_8, %c0_9], %5 {strides = array<i32>} : memref<8x1xf32, #tpu.memory_space<vmem>>, vector<8x1xf32>,
    return
  }
  func.func @transform_0(%arg0: i32) -> (i32, i32) {
    %c0_i32 = arith.constant 0 : i32
    %c0_i32_0 = arith.constant 0 : i32
    return %arg0, %c0_i32 : i32, i32
  }
  func.func @transform_1(%arg0: i32) -> (i32, i32) {
    %c0_i32 = arith.constant 0 : i32
    %c0_i32_0 = arith.constant 0 : i32
    %c0_i32_1 = arith.constant 0 : i32
    return %c0_i32, %c0_i32_0 : i32, i32
  }
  func.func @transform_2(%arg0: i32) -> (i32, i32) {
    %c0_i32 = arith.constant 0 : i32
    %c0_i32_0 = arith.constant 0 : i32
    %c0_i32_1 = arith.constant 0 : i32
    return %c0_i32, %c0_i32_0 : i32, i32
  }
  func.func @transform_3(%arg0: i32) -> (i32, i32) {
    %c0_i32 = arith.constant 0 : i32
    %c0_i32_0 = arith.constant 0 : i32
    return %arg0, %c0_i32 : i32, i32
  }
  func.func @transform_4(%arg0: i32) -> (i32, i32) {
    %c0_i32 = arith.constant 0 : i32
    %c0_i32_0 = arith.constant 0 : i32
    return %arg0, %c0_i32 : i32, i32
  }
}

module attributes {stable_mosaic.version = 11 : i64} {
  func.func @edge_proj_kernel(%arg0: i32, %arg1: memref<128x128xf32, #tpu.memory_space<vmem>>, %arg2: memref<128x128xf32, #tpu.memory_space<vmem>>, %arg3: memref<128x1xf32, #tpu.memory_space<vmem>>, %arg4: memref<128x128xf32, #tpu.memory_space<vmem>>, %arg5: memref<256x1xf32, #tpu.memory_space<vmem>>, %arg6: memref<128x256xbf16, #tpu.memory_space<vmem>>, %arg7: memref<128x1xf32, #tpu.memory_space<vmem>>) attributes {dimension_semantics = [#tpu.dimension_semantics<parallel>], iteration_bounds = array<i64: 1>, scalar_prefetch = 0 : i64, scratch_operands = 0 : i64, tpu.core_type = #tpu.core_type<tc>, window_params = [{transform_indices = @transform_0, window_bounds = array<i64: 128, 128>}, {transform_indices = @transform_1, window_bounds = array<i64: 128, 128>}, {transform_indices = @transform_2, window_bounds = array<i64: 128, 1>}, {pipeline_mode = #tpu.pipeline_mode<synchronous>, transform_indices = @transform_3, window_bounds = array<i64: 128, 128>}, {pipeline_mode = #tpu.pipeline_mode<synchronous>, transform_indices = @transform_4, window_bounds = array<i64: 256, 1>}, {transform_indices = @transform_5, window_bounds = array<i64: 128, 256>}, {transform_indices = @transform_6, window_bounds = array<i64: 128, 1>}]} {
    %c0 = arith.constant 0 : index
    %c0_0 = arith.constant 0 : index
    %0 = vector.load %arg1[%c0, %c0_0] : memref<128x128xf32, #tpu.memory_space<vmem>>, vector<128x128xf32>
    %c0_1 = arith.constant 0 : index
    %c0_2 = arith.constant 0 : index
    %1 = vector.load %arg4[%c0_1, %c0_2] : memref<128x128xf32, #tpu.memory_space<vmem>>, vector<128x128xf32>
    %cst = arith.constant dense<0.000000e+00> : vector<128x128xf32>
    %2 = tpu.matmul %0, %1, %cst {dimension_numbers = #tpu.dot_dimension_numbers<[1], [0], [0], [1], [0, 0, 1, 1], [], []>} : vector<128x128xf32>, vector<128x128xf32>, vector<128x128xf32> -> vector<128x128xf32>
    %c0_3 = arith.constant 0 : index
    %c0_4 = arith.constant 0 : index
    %3 = vector.load %arg2[%c0_3, %c0_4] : memref<128x128xf32, #tpu.memory_space<vmem>>, vector<128x128xf32>
    %4 = tpu.concatenate %3, %2 in 1 : vector<128x128xf32>, vector<128x128xf32> -> vector<128x256xf32>
    %5 = arith.truncf %4 : vector<128x256xf32> to vector<128x256xbf16>
    %c0_5 = arith.constant 0 : index
    %c0_6 = arith.constant 0 : index
    %6 = vector.load %arg6[%c0_5, %c0_6] : memref<128x256xbf16, #tpu.memory_space<vmem>>, vector<128x256xbf16>
    tpu.vector_store %arg6[%c0_5, %c0_6], %5 {strides = array<i32>} : memref<128x256xbf16, #tpu.memory_space<vmem>>, vector<128x256xbf16>,
    %c0_7 = arith.constant 0 : index
    %c0_8 = arith.constant 0 : index
    %7 = vector.load %arg5[%c0_7, %c0_8] : memref<256x1xf32, #tpu.memory_space<vmem>>, vector<256x1xf32>
    %cst_9 = arith.constant dense<0.000000e+00> : vector<128x1xf32>
    %8 = tpu.matmul %4, %7, %cst_9 {dimension_numbers = #tpu.dot_dimension_numbers<[1], [0], [0], [1], [0, 0, 1, 1], [], []>} : vector<128x256xf32>, vector<256x1xf32>, vector<128x1xf32> -> vector<128x1xf32>
    %c0_10 = arith.constant 0 : index
    %c0_11 = arith.constant 0 : index
    %9 = vector.load %arg3[%c0_10, %c0_11] : memref<128x1xf32, #tpu.memory_space<vmem>>, vector<128x1xf32>
    %10 = arith.addf %8, %9 : vector<128x1xf32>
    %cst_12 = arith.constant 0.000000e+00 : f32
    %11 = vector.broadcast %cst_12 : f32 to vector<128x1xf32>
    %12 = arith.cmpf oge, %10, %11 : vector<128x1xf32>
    %cst_13 = arith.constant 0.00999999977 : f32
    %13 = vector.broadcast %cst_13 : f32 to vector<128x1xf32>
    %14 = arith.mulf %13, %10 : vector<128x1xf32>
    %15 = arith.select %12, %10, %14 : vector<128x1xi1>, vector<128x1xf32>
    %c0_14 = arith.constant 0 : index
    %c0_15 = arith.constant 0 : index
    %16 = vector.load %arg7[%c0_14, %c0_15] : memref<128x1xf32, #tpu.memory_space<vmem>>, vector<128x1xf32>
    tpu.vector_store %arg7[%c0_14, %c0_15], %15 {strides = array<i32>} : memref<128x1xf32, #tpu.memory_space<vmem>>, vector<128x1xf32>,
    return
  }
  func.func @transform_0(%arg0: i32) -> (i32, i32) {
    %c0_i32 = arith.constant 0 : i32
    %c0_i32_0 = arith.constant 0 : i32
    return %arg0, %c0_i32 : i32, i32
  }
  func.func @transform_1(%arg0: i32) -> (i32, i32) {
    %c0_i32 = arith.constant 0 : i32
    %c0_i32_0 = arith.constant 0 : i32
    return %arg0, %c0_i32 : i32, i32
  }
  func.func @transform_2(%arg0: i32) -> (i32, i32) {
    %c0_i32 = arith.constant 0 : i32
    %c0_i32_0 = arith.constant 0 : i32
    return %arg0, %c0_i32 : i32, i32
  }
  func.func @transform_3(%arg0: i32) -> (i32, i32) {
    %c0_i32 = arith.constant 0 : i32
    %c0_i32_0 = arith.constant 0 : i32
    %c0_i32_1 = arith.constant 0 : i32
    return %c0_i32, %c0_i32_0 : i32, i32
  }
  func.func @transform_4(%arg0: i32) -> (i32, i32) {
    %c0_i32 = arith.constant 0 : i32
    %c0_i32_0 = arith.constant 0 : i32
    %c0_i32_1 = arith.constant 0 : i32
    return %c0_i32, %c0_i32_0 : i32, i32
  }
  func.func @transform_5(%arg0: i32) -> (i32, i32) {
    %c0_i32 = arith.constant 0 : i32
    %c0_i32_0 = arith.constant 0 : i32
    return %arg0, %c0_i32 : i32, i32
  }
  func.func @transform_6(%arg0: i32) -> (i32, i32) {
    %c0_i32 = arith.constant 0 : i32
    %c0_i32_0 = arith.constant 0 : i32
    return %arg0, %c0_i32 : i32, i32
  }
}

module attributes {stable_mosaic.version = 11 : i64} {
  func.func @gat_agg_kernel(%arg0: i32, %arg1: i32, %arg2: memref<1xi32, #tpu.memory_space<smem>>, %arg3: memref<1xi32, #tpu.memory_space<smem>>, %arg4: memref<128x256xbf16, #tpu.memory_space<vmem>>, %arg5: memref<1x128xf32, #tpu.memory_space<vmem>>, %arg6: memref<1x128xi32, #tpu.memory_space<vmem>>, %arg7: memref<8x128xf32, #tpu.memory_space<vmem>>, %arg8: memref<256x128xf32, #tpu.memory_space<vmem>>, %arg9: memref<8x128xf32, #tpu.memory_space<vmem>>, %arg10: memref<8x1xf32, #tpu.memory_space<vmem>>, %arg11: memref<8x1xf32, #tpu.memory_space<vmem>>, %arg12: memref<8x256xf32, #tpu.memory_space<vmem>>) attributes {dimension_semantics = [#tpu.dimension_semantics<parallel>, #tpu.dimension_semantics<arbitrary>], iteration_bounds = array<i64: 1, 1>, scalar_prefetch = 2 : i64, scratch_operands = 3 : i64, tpu.core_type = #tpu.core_type<tc>, window_params = [{transform_indices = @transform_0, window_bounds = array<i64: 128, 256>}, {transform_indices = @transform_1, window_bounds = array<i64: 1, 128>}, {transform_indices = @transform_2, window_bounds = array<i64: 1, 128>}, {transform_indices = @transform_3, window_bounds = array<i64: 8, 128>}, {pipeline_mode = #tpu.pipeline_mode<synchronous>, transform_indices = @transform_4, window_bounds = array<i64: 256, 128>}, {transform_indices = @transform_5, window_bounds = array<i64: 8, 128>}]} {
    %c0_i32 = arith.constant 0 : i32
    %0 = arith.cmpi eq, %arg1, %c0_i32 : i32
    %1 = arith.extui %0 : i1 to i32
    %c0_i32_0 = arith.constant 0 : i32
    %2 = arith.cmpi ne, %1, %c0_i32_0 : i32
    scf.if %2 {
      %cst = arith.constant -1.000000e+30 : f32
      %15 = vector.broadcast %cst : f32 to vector<8x1xf32>
      %c0 = arith.constant 0 : index
      %c0_4 = arith.constant 0 : index
      %16 = vector.load %arg10[%c0, %c0_4] : memref<8x1xf32, #tpu.memory_space<vmem>>, vector<8x1xf32>
      tpu.vector_store %arg10[%c0, %c0_4], %15 {strides = array<i32>} : memref<8x1xf32, #tpu.memory_space<vmem>>, vector<8x1xf32>,
      %cst_5 = arith.constant 0.000000e+00 : f32
      %17 = vector.broadcast %cst_5 : f32 to vector<8x1xf32>
      %c0_6 = arith.constant 0 : index
      %c0_7 = arith.constant 0 : index
      %18 = vector.load %arg11[%c0_6, %c0_7] : memref<8x1xf32, #tpu.memory_space<vmem>>, vector<8x1xf32>
      tpu.vector_store %arg11[%c0_6, %c0_7], %17 {strides = array<i32>} : memref<8x1xf32, #tpu.memory_space<vmem>>, vector<8x1xf32>,
      %cst_8 = arith.constant 0.000000e+00 : f32
      %19 = vector.broadcast %cst_8 : f32 to vector<8x256xf32>
      %c0_9 = arith.constant 0 : index
      %c0_10 = arith.constant 0 : index
      %20 = vector.load %arg12[%c0_9, %c0_10] : memref<8x256xf32, #tpu.memory_space<vmem>>, vector<8x256xf32>
      tpu.vector_store %arg12[%c0_9, %c0_10], %19 {strides = array<i32>} : memref<8x256xf32, #tpu.memory_space<vmem>>, vector<8x256xf32>,
    } else {
    }
    %3 = arith.index_cast %arg0 : i32 to index
    %4 = memref.load %arg2[%3] : memref<1xi32, #tpu.memory_space<smem>>
    %5 = arith.index_cast %arg0 : i32 to index
    %6 = memref.load %arg3[%5] : memref<1xi32, #tpu.memory_space<smem>>
    %7 = arith.cmpi sge, %arg1, %4 : i32
    %8 = arith.cmpi slt, %arg1, %6 : i32
    %9 = arith.andi %7, %8 : i1
    %10 = arith.extui %9 : i1 to i32
    %c0_i32_1 = arith.constant 0 : i32
    %11 = arith.cmpi ne, %10, %c0_i32_1 : i32
    scf.if %11 {
      %c0 = arith.constant 0 : index
      %c0_4 = arith.constant 0 : index
      %15 = vector.load %arg4[%c0, %c0_4] : memref<128x256xbf16, #tpu.memory_space<vmem>>, vector<128x256xbf16>
      %c8_i32 = arith.constant 8 : i32
      %16 = arith.muli %arg0, %c8_i32 : i32
      %17 = tpu.iota {dimensions = array<i32: 0>} : vector<8x1xi32>
      %18 = vector.broadcast %16 : i32 to vector<8x1xi32>
      %19 = arith.addi %18, %17 : vector<8x1xi32>
      %c0_5 = arith.constant 0 : index
      %c0_6 = arith.constant 0 : index
      %20 = vector.load %arg6[%c0_5, %c0_6] : memref<1x128xi32, #tpu.memory_space<vmem>>, vector<1x128xi32>
      %21 = vector.broadcast %20 : vector<1x128xi32> to vector<8x128xi32>
      %22 = vector.broadcast %19 : vector<8x1xi32> to vector<8x128xi32>
      %23 = arith.cmpi eq, %21, %22 : vector<8x128xi32>
      %c0_7 = arith.constant 0 : index
      %c0_8 = arith.constant 0 : index
      %24 = vector.load %arg5[%c0_7, %c0_8] : memref<1x128xf32, #tpu.memory_space<vmem>>, vector<1x128xf32>
      %cst = arith.constant -1.000000e+30 : f32
      %25 = vector.shape_cast %24 : vector<1x128xf32> to vector<1x128xf32>
      %26 = vector.broadcast %25 : vector<1x128xf32> to vector<8x128xf32>
      %27 = vector.broadcast %cst : f32 to vector<8x128xf32>
      %28 = arith.select %23, %26, %27 : vector<8x128xi1>, vector<8x128xf32>
      %c0_9 = arith.constant 0 : index
      %c0_10 = arith.constant 0 : index
      %29 = vector.load %arg10[%c0_9, %c0_10] : memref<8x1xf32, #tpu.memory_space<vmem>>, vector<8x1xf32>
      %cst_11 = arith.constant dense<0xFF800000> : vector<8xf32>
      %30 = vector.multi_reduction <maximumf>, %28, %cst_11 [1] : vector<8x128xf32> to vector<8xf32>
      %31 = vector.shape_cast %30 : vector<8xf32> to vector<8x1xf32>
      %32 = arith.maximumf %29, %31 : vector<8x1xf32>
      %33 = arith.subf %29, %32 : vector<8x1xf32>
      %34 = math.exp %33 : vector<8x1xf32>
      %35 = vector.broadcast %32 : vector<8x1xf32> to vector<8x128xf32>
      %36 = arith.subf %28, %35 : vector<8x128xf32>
      %37 = math.exp %36 : vector<8x128xf32>
      %cst_12 = arith.constant 0.000000e+00 : f32
      %38 = vector.broadcast %cst_12 : f32 to vector<8x128xf32>
      %39 = arith.select %23, %37, %38 : vector<8x128xi1>, vector<8x128xf32>
      %c0_13 = arith.constant 0 : index
      %c0_14 = arith.constant 0 : index
      %40 = vector.load %arg11[%c0_13, %c0_14] : memref<8x1xf32, #tpu.memory_space<vmem>>, vector<8x1xf32>
      %41 = arith.mulf %34, %40 : vector<8x1xf32>
      %cst_15 = arith.constant dense<0.000000e+00> : vector<8xf32>
      %42 = vector.multi_reduction <add>, %39, %cst_15 [1] : vector<8x128xf32> to vector<8xf32>
      %43 = vector.shape_cast %42 : vector<8xf32> to vector<8x1xf32>
      %44 = arith.addf %41, %43 : vector<8x1xf32>
      %c0_16 = arith.constant 0 : index
      %c0_17 = arith.constant 0 : index
      %45 = vector.load %arg11[%c0_16, %c0_17] : memref<8x1xf32, #tpu.memory_space<vmem>>, vector<8x1xf32>
      tpu.vector_store %arg11[%c0_16, %c0_17], %44 {strides = array<i32>} : memref<8x1xf32, #tpu.memory_space<vmem>>, vector<8x1xf32>,
      %c0_18 = arith.constant 0 : index
      %c0_19 = arith.constant 0 : index
      %46 = vector.load %arg12[%c0_18, %c0_19] : memref<8x256xf32, #tpu.memory_space<vmem>>, vector<8x256xf32>
      %47 = vector.broadcast %34 : vector<8x1xf32> to vector<8x256xf32>
      %48 = arith.mulf %47, %46 : vector<8x256xf32>
      %49 = arith.truncf %39 : vector<8x128xf32> to vector<8x128xbf16>
      %cst_20 = arith.constant dense<0.000000e+00> : vector<8x256xf32>
      %50 = tpu.matmul %49, %15, %cst_20 {dimension_numbers = #tpu.dot_dimension_numbers<[1], [0], [0], [1], [0, 0, 1, 1], [], []>} : vector<8x128xbf16>, vector<128x256xbf16>, vector<8x256xf32> -> vector<8x256xf32>
      %51 = arith.addf %48, %50 : vector<8x256xf32>
      %c0_21 = arith.constant 0 : index
      %c0_22 = arith.constant 0 : index
      %52 = vector.load %arg12[%c0_21, %c0_22] : memref<8x256xf32, #tpu.memory_space<vmem>>, vector<8x256xf32>
      tpu.vector_store %arg12[%c0_21, %c0_22], %51 {strides = array<i32>} : memref<8x256xf32, #tpu.memory_space<vmem>>, vector<8x256xf32>,
      %c0_23 = arith.constant 0 : index
      %c0_24 = arith.constant 0 : index
      %53 = vector.load %arg10[%c0_23, %c0_24] : memref<8x1xf32, #tpu.memory_space<vmem>>, vector<8x1xf32>
      tpu.vector_store %arg10[%c0_23, %c0_24], %32 {strides = array<i32>} : memref<8x1xf32, #tpu.memory_space<vmem>>, vector<8x1xf32>,
    } else {
    }
    %c0_i32_2 = arith.constant 0 : i32
    %12 = arith.cmpi eq, %arg1, %c0_i32_2 : i32
    %13 = arith.extui %12 : i1 to i32
    %c0_i32_3 = arith.constant 0 : i32
    %14 = arith.cmpi ne, %13, %c0_i32_3 : i32
    scf.if %14 {
      %c0 = arith.constant 0 : index
      %c0_4 = arith.constant 0 : index
      %15 = vector.load %arg11[%c0, %c0_4] : memref<8x1xf32, #tpu.memory_space<vmem>>, vector<8x1xf32>
      %cst = arith.constant 0.000000e+00 : f32
      %16 = vector.broadcast %cst : f32 to vector<8x1xf32>
      %17 = arith.cmpf ogt, %15, %16 : vector<8x1xf32>
      %cst_5 = arith.constant 1.000000e+00 : f32
      %18 = vector.broadcast %cst_5 : f32 to vector<8x1xf32>
      %19 = arith.select %17, %15, %18 : vector<8x1xi1>, vector<8x1xf32>
      %20 = tpu.reciprocal %19 {approx = true} : vector<8x1xf32> -> vector<8x1xf32>
      %21 = arith.mulf %19, %20 : vector<8x1xf32>
      %cst_6 = arith.constant 2.000000e+00 : f32
      %22 = vector.broadcast %cst_6 : f32 to vector<8x1xf32>
      %23 = arith.subf %22, %21 : vector<8x1xf32>
      %24 = arith.mulf %20, %23 : vector<8x1xf32>
      %c0_7 = arith.constant 0 : index
      %c0_8 = arith.constant 0 : index
      %25 = vector.load %arg12[%c0_7, %c0_8] : memref<8x256xf32, #tpu.memory_space<vmem>>, vector<8x256xf32>
      %26 = vector.broadcast %24 : vector<8x1xf32> to vector<8x256xf32>
      %27 = arith.mulf %25, %26 : vector<8x256xf32>
      %c0_9 = arith.constant 0 : index
      %c0_10 = arith.constant 0 : index
      %28 = vector.load %arg8[%c0_9, %c0_10] : memref<256x128xf32, #tpu.memory_space<vmem>>, vector<256x128xf32>
      %cst_11 = arith.constant dense<0.000000e+00> : vector<8x128xf32>
      %29 = tpu.matmul %27, %28, %cst_11 {dimension_numbers = #tpu.dot_dimension_numbers<[1], [0], [0], [1], [0, 0, 1, 1], [], []>} : vector<8x256xf32>, vector<256x128xf32>, vector<8x128xf32> -> vector<8x128xf32>
      %c0_12 = arith.constant 0 : index
      %c0_13 = arith.constant 0 : index
      %30 = vector.load %arg7[%c0_12, %c0_13] : memref<8x128xf32, #tpu.memory_space<vmem>>, vector<8x128xf32>
      %31 = vector.shape_cast %17 : vector<8x1xi1> to vector<8x1xi1>
      %32 = vector.broadcast %31 : vector<8x1xi1> to vector<8x128xi1>
      %33 = arith.select %32, %29, %30 : vector<8x128xi1>, vector<8x128xf32>
      %c0_14 = arith.constant 0 : index
      %c0_15 = arith.constant 0 : index
      %34 = vector.load %arg9[%c0_14, %c0_15] : memref<8x128xf32, #tpu.memory_space<vmem>>, vector<8x128xf32>
      tpu.vector_store %arg9[%c0_14, %c0_15], %33 {strides = array<i32>} : memref<8x128xf32, #tpu.memory_space<vmem>>, vector<8x128xf32>,
    } else {
    }
    return
  }
  func.func @transform_0(%arg0: i32, %arg1: i32, %arg2: memref<1xi32, #tpu.memory_space<smem>>, %arg3: memref<1xi32, #tpu.memory_space<smem>>) -> (i32, i32) {
    %0 = arith.index_cast %arg0 : i32 to index
    %1 = memref.load %arg2[%0] : memref<1xi32, #tpu.memory_space<smem>>
    %2 = arith.index_cast %arg0 : i32 to index
    %3 = memref.load %arg3[%2] : memref<1xi32, #tpu.memory_space<smem>>
    %c1_i32 = arith.constant 1 : i32
    %4 = arith.subi %3, %c1_i32 : i32
    %5 = arith.maxsi %4, %1 : i32
    %6 = arith.minsi %arg1, %5 : i32
    %7 = arith.maxsi %6, %1 : i32
    %c0_i32 = arith.constant 0 : i32
    %c0_i32_0 = arith.constant 0 : i32
    return %7, %c0_i32 : i32, i32
  }
  func.func @transform_1(%arg0: i32, %arg1: i32, %arg2: memref<1xi32, #tpu.memory_space<smem>>, %arg3: memref<1xi32, #tpu.memory_space<smem>>) -> (i32, i32) {
    %0 = arith.index_cast %arg0 : i32 to index
    %1 = memref.load %arg2[%0] : memref<1xi32, #tpu.memory_space<smem>>
    %2 = arith.index_cast %arg0 : i32 to index
    %3 = memref.load %arg3[%2] : memref<1xi32, #tpu.memory_space<smem>>
    %c1_i32 = arith.constant 1 : i32
    %4 = arith.subi %3, %c1_i32 : i32
    %5 = arith.maxsi %4, %1 : i32
    %6 = arith.minsi %arg1, %5 : i32
    %7 = arith.maxsi %6, %1 : i32
    %c0_i32 = arith.constant 0 : i32
    %c0_i32_0 = arith.constant 0 : i32
    return %c0_i32, %7 : i32, i32
  }
  func.func @transform_2(%arg0: i32, %arg1: i32, %arg2: memref<1xi32, #tpu.memory_space<smem>>, %arg3: memref<1xi32, #tpu.memory_space<smem>>) -> (i32, i32) {
    %0 = arith.index_cast %arg0 : i32 to index
    %1 = memref.load %arg2[%0] : memref<1xi32, #tpu.memory_space<smem>>
    %2 = arith.index_cast %arg0 : i32 to index
    %3 = memref.load %arg3[%2] : memref<1xi32, #tpu.memory_space<smem>>
    %c1_i32 = arith.constant 1 : i32
    %4 = arith.subi %3, %c1_i32 : i32
    %5 = arith.maxsi %4, %1 : i32
    %6 = arith.minsi %arg1, %5 : i32
    %7 = arith.maxsi %6, %1 : i32
    %c0_i32 = arith.constant 0 : i32
    %c0_i32_0 = arith.constant 0 : i32
    return %c0_i32, %7 : i32, i32
  }
  func.func @transform_3(%arg0: i32, %arg1: i32, %arg2: memref<1xi32, #tpu.memory_space<smem>>, %arg3: memref<1xi32, #tpu.memory_space<smem>>) -> (i32, i32) {
    %c0_i32 = arith.constant 0 : i32
    %c0_i32_0 = arith.constant 0 : i32
    return %arg0, %c0_i32 : i32, i32
  }
  func.func @transform_4(%arg0: i32, %arg1: i32, %arg2: memref<1xi32, #tpu.memory_space<smem>>, %arg3: memref<1xi32, #tpu.memory_space<smem>>) -> (i32, i32) {
    %c0_i32 = arith.constant 0 : i32
    %c0_i32_0 = arith.constant 0 : i32
    %c0_i32_1 = arith.constant 0 : i32
    return %c0_i32, %c0_i32_0 : i32, i32
  }
  func.func @transform_5(%arg0: i32, %arg1: i32, %arg2: memref<1xi32, #tpu.memory_space<smem>>, %arg3: memref<1xi32, #tpu.memory_space<smem>>) -> (i32, i32) {
    %c0_i32 = arith.constant 0 : i32
    %c0_i32_0 = arith.constant 0 : i32
    return %arg0, %c0_i32 : i32, i32
  }
}

</mosaic_0001>

<bundles_post_ra>
// kernel: custom-call
= control target key start
LH: loop header
LB: loop body
LE: loop exit
PB: predicated region body
PF: predicated region fallthrough
CT: control target
= control target key end

     0   :  { %s6_s0 = inlined_call_operand.vmem [shape: u32[2], index: 0, kind: output, shape index: {}]  }

// kernel: gat_layer_forward.3
= control target key start
LH: loop header
LB: loop body
LE: loop exit
PB: predicated region body
PF: predicated region fallthrough
CT: control target
= control target key end

     0   :  { %vm90_vm0 = vcmask 7168   ;;  %s230_s1 = inlined_call_operand.vmem [shape: f32[128,128], index: 1, kind: input, shape index: {}]   ;;  %s231_s2 = inlined_call_operand.vmem [shape: f32[128,1], index: 2, kind: input, shape index: {}]   ;;  %s232_s0 = inlined_call_operand.vmem [shape: f32[8,128], index: 0, kind: input, shape index: {}]   ;;  %s233_s3 = inlined_call_operand.vmem [shape: f32[8,128], index: 3, kind: output, shape index: {0}]   ;;  %s234_s4 = inlined_call_operand.vmem [shape: f32[8,1], index: 4, kind: output, shape index: {1}]  }
   0x1   :  { %v32_v0 = vld [vmem:[%s230_s1 + $0x78] sm:$0xff]  ;;  %v31_v1 = vld [vmem:[%s230_s1 + $0x70] sm:$0xff]  ;;  %v30_v2 = vld [vmem:[%s230_s1 + $0x68] sm:$0xff] }
   0x2   :  { %33 = vmatpush.msra.mxu0 %v32_v0  ;;  %v29_v3 = vld [vmem:[%s230_s1 + $0x60] sm:$0xff]  ;;  %v69_v4 = vld [vmem:[%s231_s2 + $0x78] sm:$0xff]  ;;  %v68_v6 = vld [vmem:[%s231_s2 + $0x70] sm:$0xff] }
   0x3   :  { %v28_v5 = vld [vmem:[%s230_s1 + $0x58] sm:$0xff]  ;;  %70 = vmatpush.msra.mxu1 %v69_v4  ;;  %v67_v7 = vld [vmem:[%s231_s2 + $0x68] sm:$0xff]  ;;  %v27_v8 = vld [vmem:[%s230_s1 + $0x50] sm:$0xff] }
   0x4   :  { %34 = vmatpush.msra.mxu0 %v31_v1  ;;  %v66_v9 = vld [vmem:[%s231_s2 + $0x60] sm:$0xff]  ;;  %v26_v10 = vld [vmem:[%s230_s1 + $0x48] sm:$0xff]  ;;  %v65_v11 = vld [vmem:[%s231_s2 + $0x58] sm:$0xff] }
   0x5   :  { %71 = vmatpush.msra.mxu1 %v68_v6  ;;  %v25_v12 = vld [vmem:[%s230_s1 + $0x40] sm:$0xff]  ;;  %v64_v13 = vld [vmem:[%s231_s2 + $0x50] sm:$0xff]  ;;  %v24_v14 = vld [vmem:[%s230_s1 + $0x38] sm:$0xff] }
   0x6   :  { %35 = vmatpush.msra.mxu0 %v30_v2  ;;  %v63_v15 = vld [vmem:[%s231_s2 + $0x48] sm:$0xff]  ;;  %v23_v16 = vld [vmem:[%s230_s1 + $0x30] sm:$0xff]  ;;  %v62_v17 = vld [vmem:[%s231_s2 + $0x40] sm:$0xff] }
   0x7   :  { %72 = vmatpush.msra.mxu1 %v67_v7  ;;  %v22_v18 = vld [vmem:[%s230_s1 + $0x28] sm:$0xff]  ;;  %v61_v19 = vld [vmem:[%s231_s2 + $0x38] sm:$0xff]  ;;  %v21_v20 = vld [vmem:[%s230_s1 + $0x20] sm:$0xff] }
   0x8   :  { %36 = vmatpush.msra.mxu0 %v29_v3  ;;  %v60_v21 = vld [vmem:[%s231_s2 + $0x30] sm:$0xff]  ;;  %v20_v22 = vld [vmem:[%s230_s1 + $0x18] sm:$0xff]  ;;  %v59_v23 = vld [vmem:[%s231_s2 + $0x28] sm:$0xff] }
   0x9   :  { %73 = vmatpush.msra.mxu1 %v66_v9  ;;  %v19_v24 = vld [vmem:[%s230_s1 + $0x10] sm:$0xff]  ;;  %v58_v25 = vld [vmem:[%s231_s2 + $0x20] sm:$0xff]  ;;  %v18_v26 = vld [vmem:[%s230_s1 + $0x8] sm:$0xff] }
   0xa   :  { %37 = vmatpush.msra.mxu0 %v28_v5  ;;  %v57_v27 = vld [vmem:[%s231_s2 + $0x18] sm:$0xff]  ;;  %v17_v28 = vld [vmem:[%s230_s1] sm:$0xff]  ;;  %v56_v30 = vld [vmem:[%s231_s2 + $0x10] sm:$0xff] }
   0xb   :  { %74 = vmatpush.msra.mxu1 %v65_v11  ;;  %v16_v29 = vld [vmem:[%s232_s0] sm:$0xff]  ;;  %v55_v31 = vld [vmem:[%s231_s2 + $0x8] sm:$0xff] }
   0xc   :  { %38 = vmatpush.msra.mxu0 %v27_v8  ;;  %v54_v32 = vld [vmem:[%s231_s2] sm:$0xff] }
   0xd   :  { %75 = vmatpush.msra.mxu1 %v64_v13 }
   0xe   :  { %39 = vmatpush.msra.mxu0 %v26_v10 }
   0xf   :  { %76 = vmatpush.msra.mxu1 %v63_v15 }
  0x10   :  { %40 = vmatpush.msra.mxu0 %v25_v12 }
  0x11   :  { %77 = vmatpush.msra.mxu1 %v62_v17 }
  0x12   :  { %41 = vmatpush.msra.mxu0 %v24_v14 }
  0x13   :  { %78 = vmatpush.msra.mxu1 %v61_v19 }
  0x14   :  { %42 = vmatpush.msra.mxu0 %v23_v16 }
  0x15   :  { %79 = vmatpush.msra.mxu1 %v60_v21 }
  0x16   :  { %43 = vmatpush.msra.mxu0 %v22_v18 }
  0x17   :  { %80 = vmatpush.msra.mxu1 %v59_v23 }
  0x18   :  { %44 = vmatpush.msra.mxu0 %v21_v20 }
  0x19   :  { %81 = vmatpush.msra.mxu1 %v58_v25 }
  0x1a   :  { %45 = vmatpush.msra.mxu0 %v20_v22 }
  0x1b   :  { %82 = vmatpush.msra.mxu1 %v57_v27 }
  0x1c   :  { %46 = vmatpush.msra.mxu0 %v19_v24 }
  0x1d   :  { %83 = vmatpush.msra.mxu1 %v56_v30 }
  0x1e   :  { %47 = vmatpush.msra.mxu0 %v18_v26 }
  0x1f   :  { %84 = vmatpush.msra.mxu1 %v55_v31 }
  0x20   :  { %48 = vmatpush.msra.mxu0 %v17_v28 }
  0x21   :  { %49 = vmatmul.f32.vlgmr.msra.gmra.mxu0 %v16_v29  ;;  %85 = vmatpush.msra.mxu1 %v54_v32 }
  0x9e   :  { %v50_v33 = vpop.f32.mrf.mxu0 }
  0x9f   :  { %53 = vst [vmem:[%s233_s3] sm:$0xff] %v50_v33  ;;  %86 = vmatmul.f32.vlgmr.msra.gmra.mxu1 %v50_v33 }
 0x11c   :  { %v87_v34 = vpop.f32.mrf.mxu1 }
 0x11d   :  { %91 = vst.msk [vmem:[%s234_s4] sm:$0xff] %vm90_vm0, %v87_v34 }

// kernel: gat_layer_forward.5
= control target key start
LH: loop header
LB: loop body
LE: loop exit
PB: predicated region body
PF: predicated region fallthrough
CT: control target
= control target key end

     0   :  { %14 = vsyncpa [#allocation9], 0  ;;  %vm202_vm0 = vcmask 7168   ;;  %v655_v0 = vmov -1e+30   ;;  %v656_v1 = vmov 0.0   ;;  %s898_s0 = inlined_call_operand.<no memory space> [shape: s32[1], index: 0, kind: input, shape index: {}]   ;;  %s899_s1 = inlined_call_operand.<no memory space> [shape: s32[1], index: 1, kind: input, shape index: {}]   ;;  %s900_s2 = inlined_call_operand.vmem [shape: bf16[128,256], index: 2, kind: input, shape index: {}]   ;;  %s901_s3 = inlined_call_operand.vmem [shape: f32[1,128], index: 3, kind: input, shape index: {}]   ;;  %s902_s4 = inlined_call_operand.vmem [shape: s32[1,128], index: 4, kind: input, shape index: {}]   ;;  %s903_s5 = inlined_call_operand.vmem [shape: f32[8,128], index: 5, kind: input, shape index: {}]   ;;  %s904_s6 = inlined_call_operand.vmem [shape: f32[256,128], index: 6, kind: input, shape index: {}]   ;;  %s905_s7 = inlined_call_operand.hbm [shape: f32[8,128], index: 7, kind: output, shape index: {}]  }
   0x1   :  { %s515_s26 = sadd.s32 4294967295, %s899_s1  ;;  %203 = vst.msk [vmem:[#allocation2] sm:$0xff] %vm202_vm0, %v655_v0  ;;  %p524_p1 = scmp.le.s32.totalorder %s898_s0, 0 }
   0x2   :  { %p134_p0 = scmp.gt.s32.totalorder %s515_s26, %s898_s0  ;;  %204 = vst.msk [vmem:[#allocation3] sm:$0xff] %vm202_vm0, %v656_v1  ;;  %p525_p2 = scmp.gt.s32.totalorder %s899_s1, 0 }
   0x3   :  { %205 = vst [vmem:[#allocation4] sm:$0xff] %v656_v1 }
   0x4   :  { %s908_s26 = smov (!%p134_p0, %s515_s26), %s898_s0  ;;  %206 = vst [vmem:[#allocation4 + $0x8] sm:$0xff] %v656_v1  ;;  %p717_p3 = pnand %p525_p2, %p524_p1 }
   0x5   :  { %p516_p4 = scmp.gt.s32.totalorder %s908_s26, 0 }
   0x7   :  { %s910_s26 = smov (%p516_p4, %s908_s26), 0 }
   0x8   :  { %p138_p5 = scmp.gt.s32.totalorder %s910_s26, %s898_s0 }
   0xa   :  { %s912_s26 = smov (!%p138_p5, %s910_s26), %s898_s0 }
   0xb   :  { %s517_s1 = sshll.u32 %s912_s26, 4  ;;  %p165_p6 = scmp.lt.s32.totalorder %s912_s26, 0 }
   0xc   :  { %p141_p7 = scmp.lt.s32.totalorder %s517_s1, 15  ;;  %214 = sbr.rel (%p717_p3) target bundleno = 403 (0x193), region = 29 }
   0xd   :  { %s914_s26 = smov (!%p165_p6, %s912_s26), 0 }
   0xe   :  { %s916_s1 = smov (!%p141_p7, %s517_s1), 15  ;;  %s167_s19 = scalar_lea.vmem %s901_s3, %s914_s26 }
   0xf   :  { %s188_s22 = scalar_lea.vmem %s902_s4, %s914_s26  ;;  %s596_s23 = sshll.u32 %s916_s1, 3 }
  0x10   :  { %s736_s27 = scalar_lea.vmem %s900_s2, %s596_s23 }
  0x11   :  { %v232_v2 = vlaneseq  ;;  %v740_v3 = vld [vmem:[%s188_s22] ss:$0 sm:$0xff]  ;;  %v657_v7 = vmov 0   ;;  %v584_v8 = vld [vmem:[%s736_s27 + $0x70] sm:$0xf] }
  0x12   :  { %v621_v4 = vld [vmem:[%s167_s19] ss:$0 sm:$0xff]  ;;  %618 = vset.pattern.permute.xlu0 %v657_v7  ;;  %619 = vset.pattern.permute.xlu1 %v657_v7  ;;  %v612_v9 = vld [vmem:[%s736_s27 + $0x74] sm:$0xf0]  ;;  %v611_v10 = vld [vmem:[%s736_s27 + $0x74] sm:$0xf] }
  0x13   :  { %v742_v5 = vshrl.u32 %v232_v2, 7  ;;  %v585_v11 = vor.u32 %v612_v9, %v584_v8  ;;  %v586_v12 = vld [vmem:[%s736_s27 + $0x78] sm:$0xf0]  ;;  %v576_v13 = vld [vmem:[%s736_s27 + $0x60] sm:$0xf]  ;;  %v260_v8 = vld [vmem:[#allocation3] sm:$0xff] }
  0x14   :  { %v610_v14 = vld [vmem:[%s736_s27 + $0x64] sm:$0xf0]  ;;  %v589_v15 = vor.u32 %v611_v10, %v586_v12  ;;  %v609_v16 = vld [vmem:[%s736_s27 + $0x64] sm:$0xf]  ;;  %v578_v17 = vld [vmem:[%s736_s27 + $0x68] sm:$0xf0] }
  0x15   :  { %vm238_vm1 = vcmp.eq.s32.totalorder %v740_v3, %v742_v5  ;;  %357 = vmatpush.bf16.msra.mxu0 %v585_v11  ;;  %v577_v18 = vor.u32 %v610_v14, %v576_v13  ;;  %v581_v19 = vor.u32 %v609_v16, %v578_v17  ;;  %v568_v20 = vld [vmem:[%s736_s27 + $0x50] sm:$0xf]  ;;  %v608_v21 = vld [vmem:[%s736_s27 + $0x54] sm:$0xf0]  ;;  %v607_v22 = vld [vmem:[%s736_s27 + $0x54] sm:$0xf] }
  0x16   :  { %v749_v6 = vsel %vm238_vm1, %v621_v4, -1e+30  ;;  %370 = vmatpush.bf16.msra.mxu1 %v589_v15  ;;  %v570_v23 = vld [vmem:[%s736_s27 + $0x58] sm:$0xf0]  ;;  %v569_v24 = vor.u32 %v608_v21, %v568_v20  ;;  %v560_v26 = vld [vmem:[%s736_s27 + $0x40] sm:$0xf]  ;;  %vm590_vm2 = vmpackc.low %vm238_vm1, %vm238_vm1 }
  0x17   :  { %245 = vmax.xlane.f32.xlu0 %v749_v6  ;;  %v573_v25 = vor.u32 %v607_v22, %v570_v23  ;;  %v606_v27 = vld [vmem:[%s736_s27 + $0x44] sm:$0xf0]  ;;  %v605_v28 = vld [vmem:[%s736_s27 + $0x44] sm:$0xf]  ;;  %v562_v29 = vld [vmem:[%s736_s27 + $0x48] sm:$0xf0] }
  0x18   :  { %v561_v30 = vor.u32 %v606_v27, %v560_v26  ;;  %v565_v31 = vor.u32 %v605_v28, %v562_v29  ;;  %v552_v32 = vld [vmem:[%s736_s27 + $0x30] sm:$0xf]  ;;  %v604_v33 = vld [vmem:[%s736_s27 + $0x34] sm:$0xf0]  ;;  %v603_v34 = vld [vmem:[%s736_s27 + $0x34] sm:$0xf] }
  0x19   :  { %358 = vmatpush.bf16.msra.mxu0 %v577_v18  ;;  %v554_v35 = vld [vmem:[%s736_s27 + $0x38] sm:$0xf0]  ;;  %v553_v36 = vor.u32 %v604_v33, %v552_v32  ;;  %v244_v37 = vld [vmem:[#allocation2] sm:$0xff]  ;;  %v602_v45 = vld [vmem:[%s736_s27 + $0x24] sm:$0xf0] }
  0x1a   :  { %371 = vmatpush.bf16.msra.mxu1 %v581_v19  ;;  %v557_v38 = vor.u32 %v603_v34, %v554_v35  ;;  %v544_v44 = vld [vmem:[%s736_s27 + $0x20] sm:$0xf]  ;;  %v601_v46 = vld [vmem:[%s736_s27 + $0x24] sm:$0xf]  ;;  %v546_v48 = vld [vmem:[%s736_s27 + $0x28] sm:$0xf0] }
  0x1b   :  { %v545_v47 = vor.u32 %v602_v45, %v544_v44  ;;  %v549_v49 = vor.u32 %v601_v46, %v546_v48  ;;  %v536_v50 = vld [vmem:[%s736_s27 + $0x10] sm:$0xf]  ;;  %v600_v51 = vld [vmem:[%s736_s27 + $0x14] sm:$0xf0]  ;;  %v599_v52 = vld [vmem:[%s736_s27 + $0x14] sm:$0xf] }
  0x1c   :  { %v537_v53 = vor.u32 %v600_v51, %v536_v50  ;;  %v538_v54 = vld [vmem:[%s736_s27 + $0x18] sm:$0xf0]  ;;  %v528_v56 = vld [vmem:[%s736_s27] sm:$0xf]  ;;  %v598_v57 = vld [vmem:[%s736_s27 + $0x4] sm:$0xf0] }
  0x1d   :  { %359 = vmatpush.bf16.msra.mxu0 %v569_v24  ;;  %v541_v55 = vor.u32 %v599_v52, %v538_v54  ;;  %v597_v58 = vld [vmem:[%s736_s27 + $0x4] sm:$0xf]  ;;  %v529_v59 = vor.u32 %v598_v57, %v528_v56  ;;  %v530_v60 = vld [vmem:[%s736_s27 + $0x8] sm:$0xf0]  ;;  %v267_v11 = vld [vmem:[#allocation4] sm:$0xff] }
  0x1e   :  { %372 = vmatpush.bf16.msra.mxu1 %v573_v25  ;;  %v533_v61 = vor.u32 %v597_v58, %v530_v60  ;;  %v268_v12 = vld [vmem:[#allocation4 + $0x8] sm:$0xff] }
  0x21   :  { %360 = vmatpush.bf16.msra.mxu0 %v561_v30 }
  0x22   :  { %373 = vmatpush.bf16.msra.mxu1 %v565_v31 }
  0x25   :  { %361 = vmatpush.bf16.msra.mxu0 %v553_v36 }
  0x26   :  { %374 = vmatpush.bf16.msra.mxu1 %v557_v38 }
  0x29   :  { %362 = vmatpush.bf16.msra.mxu0 %v545_v47 }
  0x2a   :  { %375 = vmatpush.bf16.msra.mxu1 %v549_v49 }
  0x2d   :  { %363 = vmatpush.bf16.msra.mxu0 %v537_v53 }
  0x2e   :  { %376 = vmatpush.bf16.msra.mxu1 %v541_v55 }
  0x31   :  { %364 = vmatpush.bf16.msra.mxu0 %v529_v59 }
  0x32   :  { %377 = vmatpush.bf16.msra.mxu1 %v533_v61 }
  0x8a   :  { %v246_v39 = vpop.xlane.xlu0 %245 }
  0x8b   :  { %v247_v40 = vmax.f32 %v244_v37, %v246_v39 }
  0x8d   :  { %v248_v41 = vsub.f32 %v244_v37, %v247_v40  ;;  %387 = vst.msk [vmem:[#allocation2] sm:$0xff] %vm202_vm0, %v247_v40  ;;  %253 = vperm.xlu0 %618, %v247_v40  }
  0x8f   :  { %v249_v42 = vmul.f32 1.442695, %v248_v41 }
  0x91   :  { %622 = vpow2.f32 %v249_v42 }
  0x97   :  { %v623_v43 = vpop.eup %622 }
  0x98   :  { %271 = vperm.xlu1 %619, %v623_v43   ;;  %v261_v9 = vmul.f32 %v623_v43, %v260_v8 }
  0xff   :  { %v254_v62 = vpop.permute.xlu0 %253 }
 0x100   :  { %v256_v63 = vsub.f32 %v749_v6, %v254_v62 }
 0x102   :  { %v257_v0 = vmul.f32 1.442695, %v256_v63 }
 0x104   :  { %624 = vpow2.f32 %v257_v0 }
 0x10a   :  { %v625_v1 = vpop.eup %624  ;;  %v272_v7 = vpop.permute.xlu1 %271 }
 0x10b   :  { %v259_v2 = vsel %vm238_vm1, %v625_v1, 0.0  ;;  %v591_v4 = vpack.c.bf16 %v625_v1, %v625_v1  ;;  %v274_v13 = vmul.f32 %v272_v7, %v267_v11  ;;  %v275_v14 = vmul.f32 %v272_v7, %v268_v12 }
 0x10c   :  { %262 = vadd.xlane.f32.xlu1 %v259_v2 }
 0x10d   :  { %592 = vmatmul.msk.bf16.vlgmr.msra.gmra.mxu0 %vm590_vm2, %v591_v4  ;;  %595 = vmatmul.msk.bf16.vlgmr.msra.gmra.mxu1 %vm590_vm2, %v591_v4 }
 0x17f   :  { %v263_v6 = vpop.xlane.xlu1 %262 }
 0x180   :  { %v264_v10 = vadd.f32 %v263_v6, %v261_v9 }
 0x182   :  { %266 = vst.msk [vmem:[#allocation3] sm:$0xff] %vm202_vm0, %v264_v10 }
 0x18a   :  { %v366_v15 = vpop.f32.mrf.mxu0  ;;  %v379_v16 = vpop.f32.mrf.mxu1 }
 0x18b   :  { %v383_v17 = vadd.f32 %v366_v15, %v274_v13  ;;  %v384_v3 = vadd.f32 %v379_v16, %v275_v14 }
 0x18d   :  { %385 = vst [vmem:[#allocation4] sm:$0xff] %v383_v17 }
 0x18e   :  { %386 = vst [vmem:[#allocation4 + $0x8] sm:$0xff] %v384_v3 }
 0x192   :  { %v368_v5 = vpop.f32.mrf.mxu0  ;;  %v381_v18 = vpop.f32.mrf.mxu1 }
 0x193 PF:  { %v391_v19 = vld [vmem:[#allocation3] sm:$0xff]  ;;  %v422_v20 = vld [vmem:[%s904_s6 + $0x78] sm:$0xff]  ;;  %v658_v22 = vmov 0   ;;  %v421_v23 = vld [vmem:[%s904_s6 + $0x70] sm:$0xff]  ;;  %s659_s8 = smov [#allocation8]   ;;  %s494_s12 = sshll.u32 %s905_s7, 4  ;;  %s495_s12 = int_to_ptr.hbm [resolvable:$true] %s494_s12 }
 0x194   :  { %v438_v21 = vld [vmem:[%s904_s6 + $0xf8] sm:$0xff]  ;;  %626 = vset.pattern.permute.xlu0 %v658_v22  ;;  %vm392_vm3 = vcmp.gt.f32.partialorder %v391_v19, 0.0  ;;  %439 = vmatpush.msra.mxu0 %v422_v20  ;;  %v437_v24 = vld [vmem:[%s904_s6 + $0xf0] sm:$0xff]  ;;  %v420_v26 = vld [vmem:[%s904_s6 + $0x68] sm:$0xff]  ;;  %s492_s9 = sshll.u32 %s659_s8, 4  ;;  %s493_s9 = int_to_ptr.vmem [resolvable:$true] %s492_s9 }
 0x195   :  { %v393_v25 = vsel %vm392_vm3, %v391_v19, 1.0  ;;  %459 = vmatpush.msra.mxu1 %v438_v21  ;;  %v436_v27 = vld [vmem:[%s904_s6 + $0xe8] sm:$0xff]  ;;  %v419_v28 = vld [vmem:[%s904_s6 + $0x60] sm:$0xff]  ;;  %v418_v30 = vld [vmem:[%s904_s6 + $0x58] sm:$0xff]  ;;  %v480_v49 = vsel %vm392_vm3, 1, %v658_v22 }
 0x196   :  { %627 = vrcp.f32 %v393_v25  ;;  %440 = vmatpush.msra.mxu0 %v421_v23  ;;  %v435_v29 = vld [vmem:[%s904_s6 + $0xe0] sm:$0xff]  ;;  %v434_v31 = vld [vmem:[%s904_s6 + $0xd8] sm:$0xff]  ;;  %v417_v32 = vld [vmem:[%s904_s6 + $0x50] sm:$0xff] }
 0x197   :  { %460 = vmatpush.msra.mxu1 %v437_v24  ;;  %v433_v34 = vld [vmem:[%s904_s6 + $0xd0] sm:$0xff]  ;;  %v416_v36 = vld [vmem:[%s904_s6 + $0x48] sm:$0xff]  ;;  %v415_v39 = vld [vmem:[%s904_s6 + $0x40] sm:$0xff] }
 0x198   :  { %441 = vmatpush.msra.mxu0 %v420_v26  ;;  %v432_v37 = vld [vmem:[%s904_s6 + $0xc8] sm:$0xff]  ;;  %v431_v40 = vld [vmem:[%s904_s6 + $0xc0] sm:$0xff]  ;;  %v414_v42 = vld [vmem:[%s904_s6 + $0x38] sm:$0xff] }
 0x199   :  { %461 = vmatpush.msra.mxu1 %v436_v27  ;;  %v430_v43 = vld [vmem:[%s904_s6 + $0xb8] sm:$0xff]  ;;  %v413_v44 = vld [vmem:[%s904_s6 + $0x30] sm:$0xff]  ;;  %v412_v46 = vld [vmem:[%s904_s6 + $0x28] sm:$0xff] }
 0x19a   :  { %442 = vmatpush.msra.mxu0 %v419_v28  ;;  %v429_v45 = vld [vmem:[%s904_s6 + $0xb0] sm:$0xff]  ;;  %v428_v47 = vld [vmem:[%s904_s6 + $0xa8] sm:$0xff]  ;;  %v411_v48 = vld [vmem:[%s904_s6 + $0x20] sm:$0xff] }
 0x19b   :  { %462 = vmatpush.msra.mxu1 %v435_v29  ;;  %v427_v50 = vld [vmem:[%s904_s6 + $0xa0] sm:$0xff]  ;;  %v410_v51 = vld [vmem:[%s904_s6 + $0x18] sm:$0xff]  ;;  %v409_v53 = vld [vmem:[%s904_s6 + $0x10] sm:$0xff] }
 0x19c   :  { %v628_v33 = vpop.eup %627  ;;  %443 = vmatpush.msra.mxu0 %v418_v30  ;;  %v426_v52 = vld [vmem:[%s904_s6 + $0x98] sm:$0xff]  ;;  %v425_v54 = vld [vmem:[%s904_s6 + $0x90] sm:$0xff]  ;;  %v408_v55 = vld [vmem:[%s904_s6 + $0x8] sm:$0xff] }
 0x19d   :  { %v395_v35 = vmul.f32 %v628_v33, %v393_v25  ;;  %463 = vmatpush.msra.mxu1 %v434_v31  ;;  %v424_v56 = vld [vmem:[%s904_s6 + $0x88] sm:$0xff]  ;;  %v407_v57 = vld [vmem:[%s904_s6] sm:$0xff]  ;;  %v398_v59 = vld [vmem:[#allocation4] sm:$0xff] }
 0x19e   :  { %444 = vmatpush.msra.mxu0 %v417_v32  ;;  %v423_v58 = vld [vmem:[%s904_s6 + $0x80] sm:$0xff]  ;;  %v399_v60 = vld [vmem:[#allocation4 + $0x8] sm:$0xff] }
 0x19f   :  { %v396_v38 = vsub.f32 2.0, %v395_v35  ;;  %464 = vmatpush.msra.mxu1 %v433_v34  ;;  %v479_v4 = vld [vmem:[%s903_s5] sm:$0xff] }
 0x1a0   :  { %445 = vmatpush.msra.mxu0 %v416_v36 }
 0x1a1   :  { %v397_v41 = vmul.f32 %v628_v33, %v396_v38  ;;  %465 = vmatpush.msra.mxu1 %v432_v37 }
 0x1a2   :  { %446 = vmatpush.msra.mxu0 %v415_v39 }
 0x1a3   :  { %402 = vperm.xlu0 %626, %v397_v41   ;;  %466 = vmatpush.msra.mxu1 %v431_v40 }
 0x1a4   :  { %447 = vmatpush.msra.mxu0 %v414_v42 }
 0x1a5   :  { %467 = vmatpush.msra.mxu1 %v430_v43 }
 0x1a6   :  { %448 = vmatpush.msra.mxu0 %v413_v44 }
 0x1a7   :  { %468 = vmatpush.msra.mxu1 %v429_v45 }
 0x1a8   :  { %449 = vmatpush.msra.mxu0 %v412_v46 }
 0x1a9   :  { %469 = vmatpush.msra.mxu1 %v428_v47 }
 0x1aa   :  { %450 = vmatpush.msra.mxu0 %v411_v48 }
 0x1ab   :  { %482 = vperm.xlu0 %626, %v480_v49   ;;  %470 = vmatpush.msra.mxu1 %v427_v50 }
 0x1ac   :  { %451 = vmatpush.msra.mxu0 %v410_v51 }
 0x1ad   :  { %471 = vmatpush.msra.mxu1 %v426_v52 }
 0x1ae   :  { %452 = vmatpush.msra.mxu0 %v409_v53 }
 0x1af   :  { %472 = vmatpush.msra.mxu1 %v425_v54 }
 0x1b0   :  { %453 = vmatpush.msra.mxu0 %v408_v55 }
 0x1b1   :  { %473 = vmatpush.msra.mxu1 %v424_v56 }
 0x1b2   :  { %454 = vmatpush.msra.mxu0 %v407_v57 }
 0x1b3   :  { %474 = vmatpush.msra.mxu1 %v423_v58 }
 0x215   :  { %v403_v61 = vpop.permute.xlu0 %402 }
 0x216   :  { %v405_v62 = vmul.f32 %v403_v61, %v398_v59  ;;  %v406_v63 = vmul.f32 %v403_v61, %v399_v60 }
 0x218   :  { %455 = vmatmul.f32.vlgmr.msra.gmra.mxu0 %v405_v62  ;;  %475 = vmatmul.f32.vlgmr.msra.gmra.mxu1 %v406_v63 }
 0x21d   :  { %v483_v0 = vpop.permute.xlu0 %482 }
 0x21e   :  { %vm484_vm4 = vcmp.eq.s32.totalorder %v483_v0, 1 }
 0x295   :  { %v456_v1 = vpop.f32.mrf.mxu0  ;;  %v476_v2 = vpop.f32.mrf.mxu1 }
 0x296   :  { %v477_v7 = vadd.f32 %v476_v2, %v456_v1 }
 0x298   :  { %v485_v8 = vsel %vm484_vm4, %v477_v7, %v479_v4 }
 0x299   :  { %486 = vst [vmem:[#allocation8] sm:$0xff] %v485_v8 }
 0x29a   :  { %497 = dma.vmem_to_hbm [thread:$0]  %s493_s9, 128, %s495_s12, [#allocation9]  }
 0x29b   :  { %653 = dma.done.wait [#allocation9], 128  }
 0x29c   :  { %654 = vsyncadd [#allocation9], 4294967168 }
 0x29d   :  { %502 = vsyncpa [#allocation9], 1 }

// kernel: gat_layer_forward.4
= control target key start
LH: loop header
LB: loop body
LE: loop exit
PB: predicated region body
PF: predicated region fallthrough
CT: control target
= control target key end

     0   :  { %vm393_vm1 = vcmask 7168   ;;  %s937_s3 = inlined_call_operand.vmem [shape: f32[128,128], index: 3, kind: input, shape index: {}]   ;;  %s938_s0 = inlined_call_operand.vmem [shape: f32[128,128], index: 0, kind: input, shape index: {}]   ;;  %s939_s4 = inlined_call_operand.vmem [shape: f32[256,1], index: 4, kind: input, shape index: {}]   ;;  %s940_s1 = inlined_call_operand.vmem [shape: f32[128,128], index: 1, kind: input, shape index: {}]   ;;  %s941_s5 = inlined_call_operand.vmem [shape: bf16[128,256], index: 5, kind: output, shape index: {0}]   ;;  %s942_s2 = inlined_call_operand.vmem [shape: f32[128,1], index: 2, kind: input, shape index: {}]   ;;  %s943_s6 = inlined_call_operand.vmem [shape: f32[128,1], index: 6, kind: output, shape index: {1}]  }
   0x1   :  { %v53_v0 = vld [vmem:[%s937_s3 + $0x78] sm:$0xff]  ;;  %v52_v1 = vld [vmem:[%s937_s3 + $0x70] sm:$0xff]  ;;  %v51_v2 = vld [vmem:[%s937_s3 + $0x68] sm:$0xff] }
   0x2   :  { %54 = vmatpush.msra.mxu0 %v53_v0  ;;  %418 = vmatpush.msra.mxu3 %v53_v0  ;;  %v50_v3 = vld [vmem:[%s937_s3 + $0x60] sm:$0xff]  ;;  %v49_v4 = vld [vmem:[%s937_s3 + $0x58] sm:$0xff]  ;;  %v48_v5 = vld [vmem:[%s937_s3 + $0x50] sm:$0xff] }
   0x3   :  { %v47_v6 = vld [vmem:[%s937_s3 + $0x48] sm:$0xff]  ;;  %v46_v7 = vld [vmem:[%s937_s3 + $0x40] sm:$0xff]  ;;  %v45_v8 = vld [vmem:[%s937_s3 + $0x38] sm:$0xff] }
   0x4   :  { %55 = vmatpush.msra.mxu0 %v52_v1  ;;  %419 = vmatpush.msra.mxu3 %v52_v1  ;;  %v44_v9 = vld [vmem:[%s937_s3 + $0x30] sm:$0xff]  ;;  %v43_v10 = vld [vmem:[%s937_s3 + $0x28] sm:$0xff]  ;;  %v42_v11 = vld [vmem:[%s937_s3 + $0x20] sm:$0xff] }
   0x5   :  { %v41_v12 = vld [vmem:[%s937_s3 + $0x18] sm:$0xff]  ;;  %v40_v13 = vld [vmem:[%s937_s3 + $0x10] sm:$0xff]  ;;  %v39_v14 = vld [vmem:[%s937_s3 + $0x8] sm:$0xff] }
   0x6   :  { %56 = vmatpush.msra.mxu0 %v51_v2  ;;  %420 = vmatpush.msra.mxu3 %v51_v2  ;;  %v38_v15 = vld [vmem:[%s937_s3] sm:$0xff]  ;;  %v23_v18 = vld [vmem:[%s938_s0 + $0x8] sm:$0xff]  ;;  %v24_v20 = vld [vmem:[%s938_s0 + $0x10] sm:$0xff] }
   0x7   :  { %v22_v16 = vld [vmem:[%s938_s0] sm:$0xff]  ;;  %v35_v19 = vld [vmem:[%s938_s0 + $0x68] sm:$0xff]  ;;  %v36_v21 = vld [vmem:[%s938_s0 + $0x70] sm:$0xff] }
   0x8   :  { %57 = vmatpush.msra.mxu0 %v50_v3  ;;  %421 = vmatpush.msra.mxu3 %v50_v3  ;;  %v34_v17 = vld [vmem:[%s938_s0 + $0x60] sm:$0xff]  ;;  %v25_v22 = vld [vmem:[%s938_s0 + $0x18] sm:$0xff]  ;;  %v27_v25 = vld [vmem:[%s938_s0 + $0x28] sm:$0xff] }
   0x9   :  { %v37_v23 = vld [vmem:[%s938_s0 + $0x78] sm:$0xff]  ;;  %v26_v24 = vld [vmem:[%s938_s0 + $0x20] sm:$0xff]  ;;  %v28_v26 = vld [vmem:[%s938_s0 + $0x30] sm:$0xff] }
   0xa   :  { %58 = vmatpush.msra.mxu0 %v49_v4  ;;  %422 = vmatpush.msra.mxu3 %v49_v4  ;;  %v29_v27 = vld [vmem:[%s938_s0 + $0x38] sm:$0xff]  ;;  %v181_v30 = vld [vmem:[%s939_s4 + $0x70] sm:$0xff]  ;;  %v180_v32 = vld [vmem:[%s939_s4 + $0x68] sm:$0xff] }
   0xb   :  { %v182_v28 = vld [vmem:[%s939_s4 + $0x78] sm:$0xff]  ;;  %v600_v31 = vld [vmem:[%s939_s4 + $0xf0] sm:$0xff]  ;;  %v608_v33 = vld [vmem:[%s939_s4 + $0xe8] sm:$0xff] }
   0xc   :  { %59 = vmatpush.msra.mxu0 %v48_v5  ;;  %423 = vmatpush.msra.mxu3 %v48_v5  ;;  %v591_v29 = vld [vmem:[%s939_s4 + $0xf8] sm:$0xff]  ;;  %v179_v34 = vld [vmem:[%s939_s4 + $0x60] sm:$0xff]  ;;  %v177_v39 = vld [vmem:[%s939_s4 + $0x50] sm:$0xff] }
   0xd   :  { %280 = vmatpush.msra.mxu2 %v591_v29  ;;  %215 = vmatpush.msra.mxu1 %v182_v28  ;;  %v617_v35 = vld [vmem:[%s939_s4 + $0xe0] sm:$0xff]  ;;  %v178_v37 = vld [vmem:[%s939_s4 + $0x58] sm:$0xff]  ;;  %v638_v40 = vld [vmem:[%s939_s4 + $0xd0] sm:$0xff] }
   0xe   :  { %60 = vmatpush.msra.mxu0 %v47_v6  ;;  %424 = vmatpush.msra.mxu3 %v47_v6  ;;  %v30_v36 = vld [vmem:[%s938_s0 + $0x40] sm:$0xff]  ;;  %v629_v38 = vld [vmem:[%s939_s4 + $0xd8] sm:$0xff]  ;;  %v176_v41 = vld [vmem:[%s939_s4 + $0x48] sm:$0xff] }
   0xf   :  { %281 = vmatpush.msra.mxu2 %v600_v31  ;;  %216 = vmatpush.msra.mxu1 %v181_v30  ;;  %v647_v42 = vld [vmem:[%s939_s4 + $0xc8] sm:$0xff]  ;;  %v175_v43 = vld [vmem:[%s939_s4 + $0x40] sm:$0xff]  ;;  %v174_v46 = vld [vmem:[%s939_s4 + $0x38] sm:$0xff] }
  0x10   :  { %61 = vmatpush.msra.mxu0 %v46_v7  ;;  %425 = vmatpush.msra.mxu3 %v46_v7  ;;  %v656_v44 = vld [vmem:[%s939_s4 + $0xc0] sm:$0xff]  ;;  %v31_v45 = vld [vmem:[%s938_s0 + $0x48] sm:$0xff]  ;;  %v668_v47 = vld [vmem:[%s939_s4 + $0xb8] sm:$0xff] }
  0x11   :  { %282 = vmatpush.msra.mxu2 %v608_v33  ;;  %217 = vmatpush.msra.mxu1 %v180_v32  ;;  %v173_v48 = vld [vmem:[%s939_s4 + $0x30] sm:$0xff]  ;;  %v172_v50 = vld [vmem:[%s939_s4 + $0x28] sm:$0xff]  ;;  %v171_v52 = vld [vmem:[%s939_s4 + $0x20] sm:$0xff] }
  0x12   :  { %62 = vmatpush.msra.mxu0 %v45_v8  ;;  %426 = vmatpush.msra.mxu3 %v45_v8  ;;  %v189_v49 = vld [vmem:[%s939_s4 + $0xb0] sm:$0xff]  ;;  %v188_v51 = vld [vmem:[%s939_s4 + $0xa8] sm:$0xff]  ;;  %v187_v53 = vld [vmem:[%s939_s4 + $0xa0] sm:$0xff] }
  0x13   :  { %283 = vmatpush.msra.mxu2 %v617_v35  ;;  %218 = vmatpush.msra.mxu1 %v179_v34  ;;  %v32_v54 = vld [vmem:[%s938_s0 + $0x50] sm:$0xff]  ;;  %v170_v55 = vld [vmem:[%s939_s4 + $0x18] sm:$0xff]  ;;  %v168_v59 = vld [vmem:[%s939_s4 + $0x8] sm:$0xff] }
  0x14   :  { %63 = vmatpush.msra.mxu0 %v44_v9  ;;  %427 = vmatpush.msra.mxu3 %v44_v9  ;;  %v186_v56 = vld [vmem:[%s939_s4 + $0x98] sm:$0xff]  ;;  %v169_v57 = vld [vmem:[%s939_s4 + $0x10] sm:$0xff]  ;;  %v184_v60 = vld [vmem:[%s939_s4 + $0x88] sm:$0xff] }
  0x15   :  { %284 = vmatpush.msra.mxu2 %v629_v38  ;;  %219 = vmatpush.msra.mxu1 %v178_v37  ;;  %v185_v58 = vld [vmem:[%s939_s4 + $0x90] sm:$0xff]  ;;  %v33_v61 = vld [vmem:[%s938_s0 + $0x58] sm:$0xff]  ;;  %v167_v62 = vld [vmem:[%s939_s4] sm:$0xff] }
  0x16   :  { %64 = vmatpush.msra.mxu0 %v43_v10  ;;  %428 = vmatpush.msra.mxu3 %v43_v10  ;;  %v183_v63 = vld [vmem:[%s939_s4 + $0x80] sm:$0xff]  ;;  %v132_v2 = vld [vmem:[%s940_s1 + $0x68] sm:$0xff]  ;;  %v133_v4 = vld [vmem:[%s940_s1 + $0x70] sm:$0xff] }
  0x17   :  { %285 = vmatpush.msra.mxu2 %v638_v40  ;;  %220 = vmatpush.msra.mxu1 %v177_v39  ;;  %v131_v0 = vld [vmem:[%s940_s1 + $0x60] sm:$0xff]  ;;  %v120_v3 = vld [vmem:[%s940_s1 + $0x8] sm:$0xff]  ;;  %v121_v5 = vld [vmem:[%s940_s1 + $0x10] sm:$0xff] }
  0x18   :  { %65 = vmatpush.msra.mxu0 %v42_v11  ;;  %429 = vmatpush.msra.mxu3 %v42_v11  ;;  %v119_v1 = vld [vmem:[%s940_s1] sm:$0xff]  ;;  %v134_v6 = vld [vmem:[%s940_s1 + $0x78] sm:$0xff] }
  0x19   :  { %286 = vmatpush.msra.mxu2 %v647_v42  ;;  %221 = vmatpush.msra.mxu1 %v176_v41  ;;  %v122_v7 = vld [vmem:[%s940_s1 + $0x18] sm:$0xff]  ;;  %v123_v10 = vld [vmem:[%s940_s1 + $0x20] sm:$0xff] }
  0x1a   :  { %66 = vmatpush.msra.mxu0 %v41_v12  ;;  %430 = vmatpush.msra.mxu3 %v41_v12 }
  0x1b   :  { %287 = vmatpush.msra.mxu2 %v656_v44  ;;  %222 = vmatpush.msra.mxu1 %v175_v43 }
  0x1c   :  { %67 = vmatpush.msra.mxu0 %v40_v13  ;;  %431 = vmatpush.msra.mxu3 %v40_v13 }
  0x1d   :  { %288 = vmatpush.msra.mxu2 %v668_v47  ;;  %223 = vmatpush.msra.mxu1 %v174_v46 }
  0x1e   :  { %68 = vmatpush.msra.mxu0 %v39_v14  ;;  %432 = vmatpush.msra.mxu3 %v39_v14 }
  0x1f   :  { %289 = vmatpush.msra.mxu2 %v189_v49  ;;  %224 = vmatpush.msra.mxu1 %v173_v48 }
  0x20   :  { %69 = vmatpush.msra.mxu0 %v38_v15  ;;  %433 = vmatpush.msra.mxu3 %v38_v15  ;;  %v124_v15 = vld [vmem:[%s940_s1 + $0x28] sm:$0xff] }
  0x21   :  { %70 = vmatmul.f32.vlgmr.msra.gmra.mxu0 %v22_v16  ;;  %106 = vmatmul.f32.vlgmr.msra.gmra.mxu3 %v34_v17 }
  0x22   :  { %434 = vmatpush.msrb.mxu3 %v182_v28  ;;  %290 = vmatpush.msra.mxu2 %v188_v51 }
  0x23   :  { %225 = vmatpush.msra.mxu1 %v172_v50 }
  0x24   :  { %435 = vmatpush.msrb.mxu3 %v181_v30  ;;  %291 = vmatpush.msra.mxu2 %v187_v53  ;;  %v127_v30 = vld [vmem:[%s940_s1 + $0x40] sm:$0xff] }
  0x25   :  { %226 = vmatpush.msra.mxu1 %v171_v52 }
  0x26   :  { %436 = vmatpush.msrb.mxu3 %v180_v32  ;;  %292 = vmatpush.msra.mxu2 %v186_v56 }
  0x27   :  { %227 = vmatpush.msra.mxu1 %v170_v55 }
  0x28   :  { %437 = vmatpush.msrb.mxu3 %v179_v34  ;;  %293 = vmatpush.msra.mxu2 %v185_v58 }
  0x29   :  { %73 = vmatmul.f32.gmra.mxu0 %v23_v18  ;;  %109 = vmatmul.f32.gmra.mxu3 %v35_v19 }
  0x2a   :  { %438 = vmatpush.msrb.mxu3 %v178_v37  ;;  %228 = vmatpush.msra.mxu1 %v169_v57 }
  0x2b   :  { %294 = vmatpush.msra.mxu2 %v184_v60 }
  0x2c   :  { %439 = vmatpush.msrb.mxu3 %v177_v39  ;;  %229 = vmatpush.msra.mxu1 %v168_v59  ;;  %v130_v39 = vld [vmem:[%s940_s1 + $0x58] sm:$0xff] }
  0x2d   :  { %295 = vmatpush.msra.mxu2 %v183_v63 }
  0x2e   :  { %440 = vmatpush.msrb.mxu3 %v176_v41  ;;  %230 = vmatpush.msra.mxu1 %v167_v62 }
  0x2f   :  { %231 = vmatmul.f32.vlgmr.msra.gmra.mxu1 %v119_v1 }
  0x30   :  { %441 = vmatpush.msrb.mxu3 %v175_v43 }
  0x31   :  { %76 = vmatmul.f32.gmra.mxu0 %v24_v20  ;;  %112 = vmatmul.f32.gmra.mxu3 %v36_v21  ;;  %v125_v20 = vld [vmem:[%s940_s1 + $0x30] sm:$0xff] }
  0x32   :  { %442 = vmatpush.msrb.mxu3 %v174_v46 }
  0x34   :  { %443 = vmatpush.msrb.mxu3 %v173_v48 }
  0x36   :  { %444 = vmatpush.msrb.mxu3 %v172_v50 }
  0x37   :  { %234 = vmatmul.f32.gmra.mxu1 %v120_v3 }
  0x38   :  { %445 = vmatpush.msrb.mxu3 %v171_v52 }
  0x39   :  { %79 = vmatmul.f32.gmra.mxu0 %v25_v22  ;;  %115 = vmatmul.f32.gmra.mxu3 %v37_v23 }
  0x3a   :  { %446 = vmatpush.msrb.mxu3 %v170_v55 }
  0x3c   :  { %447 = vmatpush.msrb.mxu3 %v169_v57  ;;  %v211_v57 = vld [vmem:[%s942_s2 + $0x60] sm:$0xff] }
  0x3e   :  { %448 = vmatpush.msrb.mxu3 %v168_v59 }
  0x3f   :  { %237 = vmatmul.f32.gmra.mxu1 %v121_v5 }
  0x40   :  { %449 = vmatpush.msrb.mxu3 %v167_v62 }
  0x41   :  { %82 = vmatmul.f32.gmra.mxu0 %v26_v24  ;;  %267 = vmatmul.f32.vlgmr.msrb.gmra.mxu3 %v131_v0 }
  0x42   :  { %450 = vmatpush.msra.mxu3 %v591_v29 }
  0x44   :  { %451 = vmatpush.msra.mxu3 %v600_v31 }
  0x46   :  { %452 = vmatpush.msra.mxu3 %v608_v33  ;;  %v128_v33 = vld [vmem:[%s940_s1 + $0x48] sm:$0xff] }
  0x47   :  { %240 = vmatmul.f32.gmra.mxu1 %v122_v7 }
  0x48   :  { %453 = vmatpush.msra.mxu3 %v617_v35 }
  0x49   :  { %85 = vmatmul.f32.gmra.mxu0 %v27_v25  ;;  %270 = vmatmul.f32.gmra.mxu3 %v132_v2  ;;  %v126_v25 = vld [vmem:[%s940_s1 + $0x38] sm:$0xff] }
  0x4a   :  { %454 = vmatpush.msra.mxu3 %v629_v38 }
  0x4c   :  { %455 = vmatpush.msra.mxu3 %v638_v40 }
  0x4e   :  { %456 = vmatpush.msra.mxu3 %v647_v42 }
  0x4f   :  { %243 = vmatmul.f32.gmra.mxu1 %v123_v10 }
  0x50   :  { %457 = vmatpush.msra.mxu3 %v656_v44 }
  0x51   :  { %88 = vmatmul.f32.gmra.mxu0 %v28_v26  ;;  %273 = vmatmul.f32.gmra.mxu3 %v133_v4 }
  0x52   :  { %458 = vmatpush.msra.mxu3 %v668_v47 }
  0x54   :  { %459 = vmatpush.msra.mxu3 %v189_v49 }
  0x56   :  { %460 = vmatpush.msra.mxu3 %v188_v51 }
  0x57   :  { %246 = vmatmul.f32.gmra.mxu1 %v124_v15 }
  0x58   :  { %461 = vmatpush.msra.mxu3 %v187_v53 }
  0x59   :  { %91 = vmatmul.f32.gmra.mxu0 %v29_v27  ;;  %276 = vmatmul.f32.gmra.mxu3 %v134_v6 }
  0x5a   :  { %462 = vmatpush.msra.mxu3 %v186_v56 }
  0x5c   :  { %463 = vmatpush.msra.mxu3 %v185_v58 }
  0x5e   :  { %464 = vmatpush.msra.mxu3 %v184_v60  ;;  %v200_v60 = vld [vmem:[%s942_s2 + $0x8] sm:$0xff] }
  0x5f   :  { %249 = vmatmul.f32.gmra.mxu1 %v125_v20 }
  0x60   :  { %465 = vmatpush.msra.mxu3 %v183_v63 }
  0x61   :  { %94 = vmatmul.f32.gmra.mxu0 %v30_v36  ;;  %v129_v36 = vld [vmem:[%s940_s1 + $0x50] sm:$0xff] }
  0x67   :  { %252 = vmatmul.f32.gmra.mxu1 %v126_v25 }
  0x69   :  { %97 = vmatmul.f32.gmra.mxu0 %v31_v45 }
  0x6f   :  { %255 = vmatmul.f32.gmra.mxu1 %v127_v30 }
  0x71   :  { %100 = vmatmul.f32.gmra.mxu0 %v32_v54  ;;  %v199_v54 = vld [vmem:[%s942_s2] sm:$0xff] }
  0x77   :  { %258 = vmatmul.f32.gmra.mxu1 %v128_v33 }
  0x79   :  { %103 = vmatmul.f32.gmra.mxu0 %v33_v61 }
  0x7f   :  { %261 = vmatmul.f32.gmra.mxu1 %v129_v36 }
  0x87   :  { %264 = vmatmul.f32.gmra.mxu1 %v130_v39 }
  0x9e   :  { %v71_v8 = vpop.f32.mrf.mxu0 }
  0x9f   :  { %296 = vmatmul.f32.vlgmr.msra.gmra.mxu2 %v71_v8  ;;  %v135_v9 = vpack.c.bf16 %v71_v8, %v119_v1  ;;  %v201_v8 = vld [vmem:[%s942_s2 + $0x10] sm:$0xff] }
  0xa1   :  { %151 = vst [vmem:[%s941_s5] sm:$0xff] %v135_v9 }
  0xa4   :  { %v107_v11 = vpop.f32.mrf.mxu3 }
  0xa5   :  { %v147_v12 = vpack.c.bf16 %v107_v11, %v131_v0  ;;  %332 = vmatmul.f32.vlgmr.msra.gmra.mxu3 %v107_v11 }
  0xa6   :  { %v74_v13 = vpop.f32.mrf.mxu0 }
  0xa7   :  { %299 = vmatmul.f32.gmra.mxu2 %v74_v13  ;;  %v136_v14 = vpack.c.bf16 %v74_v13, %v120_v3  ;;  %163 = vst [vmem:[%s941_s5 + $0x60] sm:$0xff] %v147_v12 }
  0xa9   :  { %152 = vst [vmem:[%s941_s5 + $0x8] sm:$0xff] %v136_v14 }
  0xac   :  { %v110_v16 = vpop.f32.mrf.mxu3  ;;  %v232_v49 = vpop.f32.mrf.mxu1 }
  0xad   :  { %v148_v17 = vpack.c.bf16 %v110_v16, %v132_v2  ;;  %335 = vmatmul.f32.gmra.mxu3 %v110_v16  ;;  %v233_v56 = vadd.f32 %v232_v49, %v199_v54 }
  0xae   :  { %v77_v18 = vpop.f32.mrf.mxu0 }
  0xaf   :  { %302 = vmatmul.f32.gmra.mxu2 %v77_v18  ;;  %v137_v19 = vpack.c.bf16 %v77_v18, %v121_v5  ;;  %164 = vst [vmem:[%s941_s5 + $0x68] sm:$0xff] %v148_v17  ;;  %v213_v17 = vld [vmem:[%s942_s2 + $0x70] sm:$0xff] }
  0xb1   :  { %153 = vst [vmem:[%s941_s5 + $0x10] sm:$0xff] %v137_v19 }
  0xb4   :  { %v113_v21 = vpop.f32.mrf.mxu3  ;;  %v235_v51 = vpop.f32.mrf.mxu1 }
  0xb5   :  { %v149_v22 = vpack.c.bf16 %v113_v21, %v133_v4  ;;  %338 = vmatmul.f32.gmra.mxu3 %v113_v21  ;;  %v236_v1 = vadd.f32 %v235_v51, %v200_v60  ;;  %v212_v4 = vld [vmem:[%s942_s2 + $0x68] sm:$0xff]  ;;  %v202_v21 = vld [vmem:[%s942_s2 + $0x18] sm:$0xff] }
  0xb6   :  { %v80_v23 = vpop.f32.mrf.mxu0  ;;  %v206_v60 = vld [vmem:[%s942_s2 + $0x38] sm:$0xff] }
  0xb7   :  { %305 = vmatmul.f32.gmra.mxu2 %v80_v23  ;;  %v138_v24 = vpack.c.bf16 %v80_v23, %v122_v7  ;;  %165 = vst [vmem:[%s941_s5 + $0x70] sm:$0xff] %v149_v22 }
  0xb9   :  { %154 = vst [vmem:[%s941_s5 + $0x18] sm:$0xff] %v138_v24 }
  0xbc   :  { %v116_v26 = vpop.f32.mrf.mxu3  ;;  %v238_v53 = vpop.f32.mrf.mxu1 }
  0xbd   :  { %v150_v27 = vpack.c.bf16 %v116_v26, %v134_v6  ;;  %341 = vmatmul.f32.gmra.mxu3 %v116_v26  ;;  %v239_v14 = vadd.f32 %v238_v53, %v201_v8  ;;  %v205_v53 = vld [vmem:[%s942_s2 + $0x30] sm:$0xff] }
  0xbe   :  { %v83_v28 = vpop.f32.mrf.mxu0 }
  0xbf   :  { %308 = vmatmul.f32.gmra.mxu2 %v83_v28  ;;  %v139_v29 = vpack.c.bf16 %v83_v28, %v123_v10  ;;  %166 = vst [vmem:[%s941_s5 + $0x78] sm:$0xff] %v150_v27 }
  0xc1   :  { %155 = vst [vmem:[%s941_s5 + $0x20] sm:$0xff] %v139_v29 }
  0xc4   :  { %v268_v48 = vpop.f32.mrf.mxu3  ;;  %v241_v61 = vpop.f32.mrf.mxu1 }
  0xc5   :  { %v269_v62 = vadd.f32 %v268_v48, %v211_v57  ;;  %v242_v26 = vadd.f32 %v241_v61, %v202_v21 }
  0xc6   :  { %v86_v31 = vpop.f32.mrf.mxu0 }
  0xc7   :  { %311 = vmatmul.f32.gmra.mxu2 %v86_v31  ;;  %v140_v32 = vpack.c.bf16 %v86_v31, %v124_v15 }
  0xc9   :  { %156 = vst [vmem:[%s941_s5 + $0x28] sm:$0xff] %v140_v32 }
  0xcc   :  { %v271_v50 = vpop.f32.mrf.mxu3  ;;  %v244_v12 = vpop.f32.mrf.mxu1 }
  0xcd   :  { %v272_v9 = vadd.f32 %v271_v50, %v212_v4 }
  0xce   :  { %v89_v34 = vpop.f32.mrf.mxu0 }
  0xcf   :  { %314 = vmatmul.f32.gmra.mxu2 %v89_v34  ;;  %v141_v35 = vpack.c.bf16 %v89_v34, %v125_v20  ;;  %v203_v34 = vld [vmem:[%s942_s2 + $0x20] sm:$0xff] }
  0xd1   :  { %157 = vst [vmem:[%s941_s5 + $0x30] sm:$0xff] %v141_v35 }
  0xd4   :  { %v274_v52 = vpop.f32.mrf.mxu3  ;;  %v247_v27 = vpop.f32.mrf.mxu1 }
  0xd5   :  { %v275_v22 = vadd.f32 %v274_v52, %v213_v17  ;;  %v209_v17 = vld [vmem:[%s942_s2 + $0x50] sm:$0xff] }
  0xd6   :  { %v92_v37 = vpop.f32.mrf.mxu0 }
  0xd7   :  { %317 = vmatmul.f32.gmra.mxu2 %v92_v37  ;;  %v142_v38 = vpack.c.bf16 %v92_v37, %v126_v25 }
  0xd9   :  { %158 = vst [vmem:[%s941_s5 + $0x38] sm:$0xff] %v142_v38 }
  0xdc   :  { %v277_v55 = vpop.f32.mrf.mxu3 }
  0xde   :  { %v95_v40 = vpop.f32.mrf.mxu0 }
  0xdf   :  { %320 = vmatmul.f32.gmra.mxu2 %v95_v40  ;;  %v143_v41 = vpack.c.bf16 %v95_v40, %v127_v30  ;;  %v214_v30 = vld [vmem:[%s942_s2 + $0x78] sm:$0xff] }
  0xe0   :  { %v278_v35 = vadd.f32 %v277_v55, %v214_v30 }
  0xe1   :  { %159 = vst [vmem:[%s941_s5 + $0x40] sm:$0xff] %v143_v41 }
  0xe6   :  { %v98_v42 = vpop.f32.mrf.mxu0 }
  0xe7   :  { %323 = vmatmul.f32.gmra.mxu2 %v98_v42  ;;  %v144_v43 = vpack.c.bf16 %v98_v42, %v128_v33 }
  0xe9   :  { %160 = vst [vmem:[%s941_s5 + $0x48] sm:$0xff] %v144_v43  ;;  %v250_v43 = vpop.f32.mrf.mxu1 }
  0xea   :  { %v251_v57 = vadd.f32 %v250_v43, %v205_v53 }
  0xee   :  { %v101_v44 = vpop.f32.mrf.mxu0 }
  0xef   :  { %326 = vmatmul.f32.gmra.mxu2 %v101_v44  ;;  %v145_v45 = vpack.c.bf16 %v101_v44, %v129_v36 }
  0xf1   :  { %161 = vst [vmem:[%s941_s5 + $0x50] sm:$0xff] %v145_v45  ;;  %v253_v54 = vpop.f32.mrf.mxu1 }
  0xf6   :  { %v104_v46 = vpop.f32.mrf.mxu0 }
  0xf7   :  { %v146_v47 = vpack.c.bf16 %v104_v46, %v130_v39  ;;  %329 = vmatmul.f32.gmra.mxu2 %v104_v46  ;;  %v245_v39 = vadd.f32 %v244_v12, %v203_v34  ;;  %v204_v46 = vld [vmem:[%s942_s2 + $0x28] sm:$0xff] }
  0xf8   :  { %v248_v50 = vadd.f32 %v247_v27, %v204_v46 }
  0xf9   :  { %162 = vst [vmem:[%s941_s5 + $0x58] sm:$0xff] %v146_v47 }
 0x122   :  { %v297_v58 = vpop.f32.mrf.mxu2 }
 0x123   :  { %v298_v59 = vadd.f32 %v297_v58, %v233_v56 }
 0x125   :  { %vm345_vm0 = vcmp.ge.f32.partialorder %v298_v59, 0.0  ;;  %v361_v63 = vmul.f32 0.01, %v298_v59 }
 0x127   :  { %v377_v0 = vsel %vm345_vm0, %v298_v59, %v361_v63 }
 0x128   :  { %394 = vst.msk [vmem:[%s943_s6] sm:$0xff] %vm393_vm1, %v377_v0  ;;  %v333_v2 = vpop.f32.mrf.mxu3  ;;  %v254_v0 = vadd.f32 %v253_v54, %v206_v60 }
 0x129   :  { %v334_v3 = vadd.f32 %v333_v2, %v269_v62  ;;  %v256_v62 = vpop.f32.mrf.mxu1 }
 0x12a   :  { %v300_v5 = vpop.f32.mrf.mxu2 }
 0x12b   :  { %v301_v6 = vadd.f32 %v300_v5, %v236_v1  ;;  %vm357_vm2 = vcmp.ge.f32.partialorder %v334_v3, 0.0  ;;  %v373_v7 = vmul.f32 0.01, %v334_v3 }
 0x12d   :  { %vm346_vm3 = vcmp.ge.f32.partialorder %v301_v6, 0.0  ;;  %v362_v10 = vmul.f32 0.01, %v301_v6  ;;  %v389_v11 = vsel %vm357_vm2, %v334_v3, %v373_v7  ;;  %v207_v3 = vld [vmem:[%s942_s2 + $0x40] sm:$0xff] }
 0x12e   :  { %406 = vst.msk [vmem:[%s943_s6 + $0x60] sm:$0xff] %vm393_vm1, %v389_v11 }
 0x12f   :  { %v378_v13 = vsel %vm346_vm3, %v301_v6, %v362_v10  ;;  %v257_v6 = vadd.f32 %v256_v62, %v207_v3  ;;  %v208_v10 = vld [vmem:[%s942_s2 + $0x48] sm:$0xff] }
 0x130   :  { %395 = vst.msk [vmem:[%s943_s6 + $0x8] sm:$0xff] %vm393_vm1, %v378_v13  ;;  %v336_v15 = vpop.f32.mrf.mxu3 }
 0x131   :  { %v337_v16 = vadd.f32 %v336_v15, %v272_v9  ;;  %v259_v7 = vpop.f32.mrf.mxu1 }
 0x132   :  { %v303_v18 = vpop.f32.mrf.mxu2  ;;  %v260_v13 = vadd.f32 %v259_v7, %v208_v10 }
 0x133   :  { %v304_v19 = vadd.f32 %v303_v18, %v239_v14  ;;  %vm358_vm4 = vcmp.ge.f32.partialorder %v337_v16, 0.0  ;;  %v374_v20 = vmul.f32 0.01, %v337_v16 }
 0x135   :  { %vm347_vm5 = vcmp.ge.f32.partialorder %v304_v19, 0.0  ;;  %v363_v23 = vmul.f32 0.01, %v304_v19  ;;  %v390_v24 = vsel %vm358_vm4, %v337_v16, %v374_v20 }
 0x136   :  { %407 = vst.msk [vmem:[%s943_s6 + $0x68] sm:$0xff] %vm393_vm1, %v390_v24 }
 0x137   :  { %v379_v25 = vsel %vm347_vm5, %v304_v19, %v363_v23  ;;  %v210_v23 = vld [vmem:[%s942_s2 + $0x58] sm:$0xff] }
 0x138   :  { %396 = vst.msk [vmem:[%s943_s6 + $0x10] sm:$0xff] %vm393_vm1, %v379_v25  ;;  %v339_v28 = vpop.f32.mrf.mxu3 }
 0x139   :  { %v340_v29 = vadd.f32 %v339_v28, %v275_v22  ;;  %v262_v15 = vpop.f32.mrf.mxu1 }
 0x13a   :  { %v306_v31 = vpop.f32.mrf.mxu2  ;;  %v263_v20 = vadd.f32 %v262_v15, %v209_v17 }
 0x13b   :  { %v307_v32 = vadd.f32 %v306_v31, %v242_v26  ;;  %vm359_vm6 = vcmp.ge.f32.partialorder %v340_v29, 0.0  ;;  %v375_v33 = vmul.f32 0.01, %v340_v29 }
 0x13d   :  { %vm348_vm7 = vcmp.ge.f32.partialorder %v307_v32, 0.0  ;;  %v364_v36 = vmul.f32 0.01, %v307_v32  ;;  %v391_v37 = vsel %vm359_vm6, %v340_v29, %v375_v33 }
 0x13e   :  { %408 = vst.msk [vmem:[%s943_s6 + $0x70] sm:$0xff] %vm393_vm1, %v391_v37 }
 0x13f   :  { %v380_v38 = vsel %vm348_vm7, %v307_v32, %v364_v36 }
 0x140   :  { %397 = vst.msk [vmem:[%s943_s6 + $0x18] sm:$0xff] %vm393_vm1, %v380_v38  ;;  %v342_v40 = vpop.f32.mrf.mxu3 }
 0x141   :  { %v343_v41 = vadd.f32 %v342_v40, %v278_v35  ;;  %v265_v24 = vpop.f32.mrf.mxu1 }
 0x142   :  { %v309_v42 = vpop.f32.mrf.mxu2  ;;  %v266_v27 = vadd.f32 %v265_v24, %v210_v23 }
 0x143   :  { %v310_v44 = vadd.f32 %v309_v42, %v245_v39  ;;  %vm360_vm8 = vcmp.ge.f32.partialorder %v343_v41, 0.0  ;;  %v376_v45 = vmul.f32 0.01, %v343_v41 }
 0x145   :  { %vm349_vm9 = vcmp.ge.f32.partialorder %v310_v44, 0.0  ;;  %v365_v47 = vmul.f32 0.01, %v310_v44  ;;  %v392_v48 = vsel %vm360_vm8, %v343_v41, %v376_v45 }
 0x146   :  { %409 = vst.msk [vmem:[%s943_s6 + $0x78] sm:$0xff] %vm393_vm1, %v392_v48 }
 0x147   :  { %v381_v49 = vsel %vm349_vm9, %v310_v44, %v365_v47 }
 0x148   :  { %398 = vst.msk [vmem:[%s943_s6 + $0x20] sm:$0xff] %vm393_vm1, %v381_v49 }
 0x14a   :  { %v312_v51 = vpop.f32.mrf.mxu2 }
 0x14b   :  { %v313_v52 = vadd.f32 %v312_v51, %v248_v50 }
 0x14d   :  { %vm350_vm10 = vcmp.ge.f32.partialorder %v313_v52, 0.0  ;;  %v366_v55 = vmul.f32 0.01, %v313_v52 }
 0x14f   :  { %v382_v56 = vsel %vm350_vm10, %v313_v52, %v366_v55 }
 0x150   :  { %399 = vst.msk [vmem:[%s943_s6 + $0x28] sm:$0xff] %vm393_vm1, %v382_v56 }
 0x152   :  { %v315_v58 = vpop.f32.mrf.mxu2 }
 0x153   :  { %v316_v59 = vadd.f32 %v315_v58, %v251_v57 }
 0x155   :  { %vm351_vm11 = vcmp.ge.f32.partialorder %v316_v59, 0.0  ;;  %v367_v61 = vmul.f32 0.01, %v316_v59 }
 0x157   :  { %v383_v63 = vsel %vm351_vm11, %v316_v59, %v367_v61 }
 0x158   :  { %400 = vst.msk [vmem:[%s943_s6 + $0x30] sm:$0xff] %vm393_vm1, %v383_v63 }
 0x15a   :  { %v318_v1 = vpop.f32.mrf.mxu2 }
 0x15b   :  { %v319_v2 = vadd.f32 %v318_v1, %v254_v0 }
 0x15d   :  { %vm352_vm12 = vcmp.ge.f32.partialorder %v319_v2, 0.0  ;;  %v368_v4 = vmul.f32 0.01, %v319_v2 }
 0x15f   :  { %v384_v5 = vsel %vm352_vm12, %v319_v2, %v368_v4 }
 0x160   :  { %401 = vst.msk [vmem:[%s943_s6 + $0x38] sm:$0xff] %vm393_vm1, %v384_v5 }
 0x162   :  { %v321_v8 = vpop.f32.mrf.mxu2 }
 0x163   :  { %v322_v9 = vadd.f32 %v321_v8, %v257_v6 }
 0x165   :  { %vm353_vm13 = vcmp.ge.f32.partialorder %v322_v9, 0.0  ;;  %v369_v11 = vmul.f32 0.01, %v322_v9 }
 0x167   :  { %v385_v12 = vsel %vm353_vm13, %v322_v9, %v369_v11 }
 0x168   :  { %402 = vst.msk [vmem:[%s943_s6 + $0x40] sm:$0xff] %vm393_vm1, %v385_v12 }
 0x16a   :  { %v324_v14 = vpop.f32.mrf.mxu2 }
 0x16b   :  { %v325_v16 = vadd.f32 %v324_v14, %v260_v13 }
 0x16d   :  { %vm354_vm14 = vcmp.ge.f32.partialorder %v325_v16, 0.0  ;;  %v370_v18 = vmul.f32 0.01, %v325_v16 }
 0x16f   :  { %v386_v19 = vsel %vm354_vm14, %v325_v16, %v370_v18 }
 0x170   :  { %403 = vst.msk [vmem:[%s943_s6 + $0x48] sm:$0xff] %vm393_vm1, %v386_v19 }
 0x172   :  { %v327_v21 = vpop.f32.mrf.mxu2 }
 0x173   :  { %v328_v22 = vadd.f32 %v327_v21, %v263_v20 }
 0x175   :  { %vm355_vm15 = vcmp.ge.f32.partialorder %v328_v22, 0.0  ;;  %v371_v25 = vmul.f32 0.01, %v328_v22 }
 0x177   :  { %v387_v26 = vsel %vm355_vm15, %v328_v22, %v371_v25 }
 0x178   :  { %404 = vst.msk [vmem:[%s943_s6 + $0x50] sm:$0xff] %vm393_vm1, %v387_v26 }
 0x17a   :  { %v330_v28 = vpop.f32.mrf.mxu2 }
 0x17b   :  { %v331_v29 = vadd.f32 %v330_v28, %v266_v27 }
 0x17d   :  { %vm356_vm0 = vcmp.ge.f32.partialorder %v331_v29, 0.0  ;;  %v372_v30 = vmul.f32 0.01, %v331_v29 }
 0x17f   :  { %v388_v31 = vsel %vm356_vm0, %v331_v29, %v372_v30 }
 0x180   :  { %405 = vst.msk [vmem:[%s943_s6 + $0x58] sm:$0xff] %vm393_vm1, %v388_v31 }

</bundles_post_ra>
